<compile_context>
chip_gen: v7x
topology: tpu7x:2x2x1
jax: 0.10.0
libtpu: 0.0.40
codegen_flags: <defaults>
</compile_context>

<pallas_src>
import numpy as np
import jax
import jax.numpy as jnp
from jax import lax
from jax.experimental import pallas as pl
from jax.experimental.pallas import tpu as pltpu

EPS = 1e-5
LANE = 128


# ------------------------------ fused kernel -------------------------------

def _make_block_kernel(N, H, W, compute_dtype):
    M = N * H                                  # all images' rows at once
    inv_count = 1.0 / float(N * H * W)         # global BN count (training-mode stats)
    cdt = compute_dtype

    def kernel(x_ref, t_ref, b1_ref, b2_ref, b4_ref, wt_ref, rsame_ref, sel_ref,
               vec_ref, o_ref):
        # Per-row masks for the image-boundary rows (zero padding in y).
        y = lax.broadcasted_iota(jnp.int32, (M, 1), 0) % H
        top, bot, bot2 = (y == 0), (y == H - 1), (y >= H - 2)

        def shift_rows(a, delta, mask):
            # out[g, :] = a[g + delta, :] within an image.  pltpu.roll follows
            # jnp.roll semantics (out[i] = a[(i - shift) % M]) so shift = (-delta) % M;
            # rows whose source lies outside the image (or in the neighbouring image
            # after the circular roll) are zeroed by `mask`.  XLU/VPU work, no MXU.
            s = pltpu.roll(a, (-delta) % M, axis=0) if delta else a
            return jnp.where(mask, 0.0, s) if mask is not None else s

        def mm(a, b):
            return jnp.dot(a.astype(cdt), b.astype(cdt),
                           preferred_element_type=jnp.float32)

        def conv3x3(a, band_ref, bias):
            # 3x3 / pad-1 conv as ONE matmul: lane-concat the 3 row-shifted copies
            # (K = 3 * lanes) against the K-stacked banded weights.
            acat = jnp.concatenate(
                [shift_rows(a, -1, top), a, shift_rows(a, +1, bot)], axis=1)
            return mm(acat, band_ref[...]) + bias

        def batchnorm(z, gamma, beta):
            # Centred two-pass BN with GLOBAL batch statistics (biased variance).
            # The per-channel reduce over the W positions interleaved in the lane dim
            # (and the broadcast back) is a tiny (1,WC)x(WC,WC) matmul with
            # Rsame[i,j] = [i%C == j%C]  -> no relayouts needed.
            rsum = jnp.sum(z, axis=0, keepdims=True)                    # (1, WC)
            mean = mm(rsum, rsame_ref[...]) * inv_count                 # per-lane channel mean
            d = z - mean
            vsum = jnp.sum(d * d, axis=0, keepdims=True)
            var = mm(vsum, rsame_ref[...]) * inv_count
            return d * (gamma * lax.rsqrt(var + EPS)) + beta

        b1, g1, be1, bt = (vec_ref[0:1, :], vec_ref[1:2, :],
                           vec_ref[2:3, :], vec_ref[3:4, :])
        b2, g2, be2, btr = (vec_ref[4:5, :], vec_ref[5:6, :],
                            vec_ref[6:7, :], vec_ref[7:8, :])

        # conv1 + bias + ReLU + BN1  (conv1 input lanes pre-padded to a 128 multiple)
        z1 = jnp.maximum(conv3x3(x_ref[...], b1_ref, b1), 0.0)
        h = batchnorm(z1, g1, be1)

        # time-MLP (folded in; t is row-replicated in the wrapper) + add
        h = h + jnp.maximum(mm(t_ref[...], wt_ref[...]) + bt, 0.0)

        # conv2 + bias + ReLU + BN2
        z2 = jnp.maximum(conv3x3(h, b2_ref, b2), 0.0)
        h = batchnorm(z2, g2, be2)

        # transform: Conv2d(C, C, 4, stride=2, pad=1)  (up=False branch)
        # TODO(synk): up=True branch (ConvTranspose2d 4x4 stride 2) not implemented.
        hcat = jnp.concatenate(
            [shift_rows(h, -1, top), h,
             shift_rows(h, +1, bot), shift_rows(h, +2, bot2)], axis=1)   # (M, 4*WC)
        hsel = mm(sel_ref[...], hcat)            # even-row (y-stride-2) select: (N*Ho, 4*WC)
        out = mm(hsel, b4_ref[...]) + btr        # (N*Ho, 128): lanes >= Wo*C are zero pad
        o_ref[...] = out.astype(o_ref.dtype)

    return kernel


# ------------------------ wrapper-side weight prep --------------------------
# Tiny, one-time transforms of the conv weights into K-stacked banded matrices
# (the x zero-padding is folded into the band; the y zero-padding is handled by
# the in-kernel roll masks).

def _banded_3x3(w_hwio, W, row_pad):
    # B[ky-block][xi*Cin+ci, xo*Cout+co] = w[ky, xi-xo+1, ci, co]; each ky block's
    # rows are padded by `row_pad` so they line up with the 128-lane-padded input.
    blocks = []
    for ky in range(3):
        b = sum(jnp.kron(jnp.eye(W, k=1 - kx, dtype=jnp.float32), w_hwio[ky, kx])
                for kx in range(3))                              # (W*Cin, W*Cout)
        blocks.append(jnp.pad(b, ((0, row_pad), (0, 0))))
    return jnp.concatenate(blocks, axis=0)


def _banded_4x4_s2(w_hwio, W, col_pad):
    # Banded weights for the 4x4 / stride-2 / pad-1 conv; output columns are
    # zero-padded by `col_pad` so the kernel's final store is a full 128-lane store.
    C, Cout = w_hwio.shape[2], w_hwio.shape[3]
    Wo = W // 2
    blocks = []
    for ky in range(4):
        b = jnp.zeros((W * C, Wo * Cout), jnp.float32)
        for kx in range(4):
            ox = np.arange(Wo)
            xi = 2 * ox + kx - 1
            m = (xi >= 0) & (xi < W)
            P = jnp.zeros((W, Wo), jnp.float32).at[xi[m], ox[m]].set(1.0)
            b = b + jnp.kron(P, w_hwio[ky, kx])
        blocks.append(jnp.pad(b, ((0, 0), (0, col_pad))))
    return jnp.concatenate(blocks, axis=0)                       # (4*W*C, Wo*Cout+col_pad)


# ----------------------------- Block forward -------------------------------

def block_forward_nhwc(params, x_nhwc, t, *, compute_dtype=jnp.float32):
    """Fused Block forward on NHWC activations (row-major (N*H, W*C) inside).

    In a UNet stack call this directly and stay NHWC across Blocks; block_forward()
    only adds the NCHW<->NHWC boundary transposes needed by the PyTorch reference.
    """
    N, H, W, Cin = x_nhwc.shape
    Cout = params["w1"].shape[-1]
    Dt = params["wt"].shape[0]
    Ho, Wo = H // 2, W // 2
    WC, WoC = W * Cout, Wo * Cout          # note: 2*WoC == WC  (lane-dense output pad)
    M, Mo = N * H, N * Ho
    cdt = compute_dtype

    # Activations: one row per image row, lane dim = W*C (lane dense; W*Cout should be
    # a multiple of 128 for peak efficiency -- true here: 16*8 = 128).
    WCin = W * Cin
    lane_pad = (-WCin) % LANE              # pad conv1 input lanes up to a 128 multiple
    x = x_nhwc.reshape(M, WCin)
    if lane_pad:
        x = jnp.pad(x, ((0, 0), (0, lane_pad)))
    t_rep = jnp.repeat(t, H, axis=0)       # (M, Dt): time embedding per activation row

    # One-time weight prep (tiny, plain XLA).
    B1 = _banded_3x3(params["w1"], W, lane_pad).astype(cdt)      # (3*(WCin+pad), WC)
    B2 = _banded_3x3(params["w2"], W, 0).astype(cdt)             # (3*WC, WC)
    B4 = _banded_4x4_s2(params["wtr"], W, WC - WoC).astype(cdt)  # (4*WC, WC)
    wt = jnp.tile(params["wt"], (1, W)).astype(cdt)              # (Dt, WC)
    rsame = jnp.asarray(                                         # per-channel reduce/bcast
        np.arange(WC)[:, None] % Cout == np.arange(WC)[None, :] % Cout, dtype=cdt)
    sel_np = np.zeros((Mo, M), np.float32)                       # even-row (stride-2) select
    sel_np[np.arange(Mo), 2 * np.arange(Mo)] = 1.0
    sel = jnp.asarray(sel_np, dtype=cdt)
    vecs = jnp.stack([                                           # packed (8, WC) per-lane vecs
        jnp.tile(params["b1"], W), jnp.tile(params["g1"], W), jnp.tile(params["be1"], W),
        jnp.tile(params["bt"], W), jnp.tile(params["b2"], W), jnp.tile(params["g2"], W),
        jnp.tile(params["be2"], W),
        jnp.pad(jnp.tile(params["btr"], Wo), (0, WC - WoC)),
    ]).astype(jnp.float32)

    kernel = _make_block_kernel(N, H, W, cdt)
    inputs = (x, t_rep, B1, B2, B4, wt, rsame, sel, vecs)

    def full(a):
        return pl.BlockSpec(a.shape, lambda i: (0, 0))           # all inputs are 2-D

    k1, k2, k4 = B1.shape[0], B2.shape[0], B4.shape[0]
    flops = 2 * (M * k1 * WC + M * k2 * WC + M * Dt * WC
                 + Mo * M * 4 * WC + Mo * k4 * WC + 4 * WC * WC)
    bytes_accessed = 4 * (sum(int(np.prod(a.shape)) for a in inputs) + Mo * WC)

    out = pl.pallas_call(
        kernel,
        grid=(1,),      # whole Block fused in one step; for production N, chunk the
                        # batch over a "parallel" grid axis + two-phase BN instead.
        in_specs=[full(a) for a in inputs],
        out_specs=pl.BlockSpec((Mo, WC), lambda i: (0, 0)),
        out_shape=jax.ShapeDtypeStruct((Mo, WC), jnp.float32),
        compiler_params=pltpu.CompilerParams(dimension_semantics=("arbitrary",)),
        cost_estimate=pl.CostEstimate(flops=int(flops), transcendentals=2 * WC,
                                      bytes_accessed=int(bytes_accessed)),
    )(*inputs)

    return out[:, :WoC].reshape(N, Ho, Wo, Cout)                 # drop the lane padding


def block_forward(params, x_nchw, t, *, compute_dtype=jnp.float32):
    # NCHW<->NHWC only at the Block boundary (matches the PyTorch spec); a UNet stack
    # should call block_forward_nhwc directly and skip these two HBM passes per Block.
    x_nhwc = jnp.transpose(x_nchw, (0, 2, 3, 1))
    out = block_forward_nhwc(params, x_nhwc, t, compute_dtype=compute_dtype)
    return jnp.transpose(out, (0, 3, 1, 2))


# ----------------------------- params & reference ---------------------------

def init_params(key, in_ch, out_ch, time_emb_dim):
    ks = jax.random.split(key, 8)
    s = 0.1
    f32 = jnp.float32
    return {
        "wt": s * jax.random.normal(ks[0], (time_emb_dim, out_ch), f32),
        "bt": s * jax.random.normal(ks[1], (out_ch,), f32),
        "w1": s * jax.random.normal(ks[2], (3, 3, in_ch, out_ch), f32),   # HWIO
        "b1": s * jax.random.normal(ks[3], (out_ch,), f32),
        "w2": s * jax.random.normal(ks[4], (3, 3, out_ch, out_ch), f32),
        "b2": s * jax.random.normal(ks[5], (out_ch,), f32),
        "wtr": s * jax.random.normal(ks[6], (4, 4, out_ch, out_ch), f32),
        "btr": s * jax.random.normal(ks[7], (out_ch,), f32),
        "g1": jnp.ones((out_ch,), f32), "be1": jnp.zeros((out_ch,), f32),
        "g2": jnp.ones((out_ch,), f32), "be2": jnp.zeros((out_ch,), f32),
    }


def ref_forward(params, x, t):
    def conv(x, w_hwio, b, stride, pad):
        w = jnp.transpose(w_hwio, (3, 2, 0, 1))               # OIHW
        y = lax.conv_general_dilated(x, w, (stride, stride), ((pad, pad), (pad, pad)),
                                     dimension_numbers=("NCHW", "OIHW", "NCHW"))
        return y + b[None, :, None, None]

    def bn(x, g, b):
        m = jnp.mean(x, axis=(0, 2, 3), keepdims=True)
        v = jnp.mean((x - m) ** 2, axis=(0, 2, 3), keepdims=True)
        return (x - m) / jnp.sqrt(v + EPS) * g[None, :, None, None] + b[None, :, None, None]

    h = bn(jax.nn.relu(conv(x, params["w1"], params["b1"], 1, 1)), params["g1"], params["be1"])
    temb = jax.nn.relu(t @ params["wt"] + params["bt"])
    h = h + temb[:, :, None, None]
    h = bn(jax.nn.relu(conv(h, params["w2"], params["b2"], 1, 1)), params["g2"], params["be2"])
    return conv(h, params["wtr"], params["btr"], 2, 1)


if __name__ == "__main__":
    in_ch, out_ch, time_emb_dim = 4, 8, 32
    N, H, W = 2, 16, 16

    key = jax.random.PRNGKey(0)
    kp, kx, kt = jax.random.split(key, 3)
    params = init_params(kp, in_ch, out_ch, time_emb_dim)
    x = jax.random.normal(kx, (N, in_ch, H, W), jnp.float32)
    t = jax.random.normal(kt, (N, time_emb_dim), jnp.float32)

    out = jax.block_until_ready(jax.jit(block_forward)(params, x, t))
    ref = jax.block_until_ready(ref_forward(params, x, t))

    assert out.shape == (N, out_ch, H // 2, W // 2), out.shape
    err = float(jnp.max(jnp.abs(out - ref)))
    assert err < 2e-3, f"max abs error {err}"
    print("KERNEL_OK")
</pallas_src>

<mosaic_0001>
module attributes {stable_mosaic.version = 11 : i64} {
  func.func @kernel(%arg0: i32, %arg1: memref<32x128xf32, #tpu.memory_space<vmem>>, %arg2: memref<32x32xf32, #tpu.memory_space<vmem>>, %arg3: memref<384x128xf32, #tpu.memory_space<vmem>>, %arg4: memref<384x128xf32, #tpu.memory_space<vmem>>, %arg5: memref<512x128xf32, #tpu.memory_space<vmem>>, %arg6: memref<32x128xf32, #tpu.memory_space<vmem>>, %arg7: memref<128x128xf32, #tpu.memory_space<vmem>>, %arg8: memref<16x32xf32, #tpu.memory_space<vmem>>, %arg9: memref<8x128xf32, #tpu.memory_space<vmem>>, %arg10: memref<16x128xf32, #tpu.memory_space<vmem>>) attributes {dimension_semantics = [#tpu.dimension_semantics<arbitrary>], iteration_bounds = array<i64: 1>, scalar_prefetch = 0 : i64, scratch_operands = 0 : i64, tpu.core_type = #tpu.core_type<tc>, window_params = [{pipeline_mode = #tpu.pipeline_mode<synchronous>, transform_indices = @transform_0, window_bounds = array<i64: 32, 128>}, {pipeline_mode = #tpu.pipeline_mode<synchronous>, transform_indices = @transform_1, window_bounds = array<i64: 32, 32>}, {pipeline_mode = #tpu.pipeline_mode<synchronous>, transform_indices = @transform_2, window_bounds = array<i64: 384, 128>}, {pipeline_mode = #tpu.pipeline_mode<synchronous>, transform_indices = @transform_3, window_bounds = array<i64: 384, 128>}, {pipeline_mode = #tpu.pipeline_mode<synchronous>, transform_indices = @transform_4, window_bounds = array<i64: 512, 128>}, {pipeline_mode = #tpu.pipeline_mode<synchronous>, transform_indices = @transform_5, window_bounds = array<i64: 32, 128>}, {pipeline_mode = #tpu.pipeline_mode<synchronous>, transform_indices = @transform_6, window_bounds = array<i64: 128, 128>}, {pipeline_mode = #tpu.pipeline_mode<synchronous>, transform_indices = @transform_7, window_bounds = array<i64: 16, 32>}, {pipeline_mode = #tpu.pipeline_mode<synchronous>, transform_indices = @transform_8, window_bounds = array<i64: 8, 128>}, {pipeline_mode = #tpu.pipeline_mode<synchronous>, transform_indices = @transform_9, window_bounds = array<i64: 16, 128>}]} {
    %0 = tpu.iota {dimensions = array<i32: 0>} : vector<32x1xi32>
    %c16_i32 = arith.constant 16 : i32
    %c0_i32 = arith.constant 0 : i32
    %1 = arith.cmpi eq, %c16_i32, %c0_i32 : i32
    %c1_i32 = arith.constant 1 : i32
    %2 = arith.select %1, %c1_i32, %c16_i32 : i32
    %3 = vector.broadcast %2 : i32 to vector<32x1xi32>
    %4 = arith.remsi %0, %3 : vector<32x1xi32>
    %c0_i32_0 = arith.constant 0 : i32
    %5 = vector.broadcast %c0_i32_0 : i32 to vector<32x1xi32>
    %6 = arith.cmpi ne, %4, %5 : vector<32x1xi32>
    %c0_i32_1 = arith.constant 0 : i32
    %7 = vector.broadcast %c0_i32_1 : i32 to vector<32x1xi32>
    %8 = arith.cmpi slt, %4, %7 : vector<32x1xi32>
    %c0_i32_2 = arith.constant 0 : i32
    %9 = arith.cmpi slt, %2, %c0_i32_2 : i32
    %10 = vector.broadcast %9 : i1 to vector<32x1xi1>
    %11 = vector.broadcast %10 : vector<32x1xi1> to vector<32x1xi1>
    %12 = arith.xori %8, %11 : vector<32x1xi1>
    %13 = arith.andi %12, %6 : vector<32x1xi1>
    %14 = vector.broadcast %2 : i32 to vector<32x1xi32>
    %15 = arith.addi %4, %14 : vector<32x1xi32>
    %16 = arith.select %13, %15, %4 : vector<32x1xi1>, vector<32x1xi32>
    %c0_i32_3 = arith.constant 0 : i32
    %17 = vector.broadcast %c0_i32_3 : i32 to vector<32x1xi32>
    %18 = arith.cmpi eq, %16, %17 : vector<32x1xi32>
    %c15_i32 = arith.constant 15 : i32
    %19 = vector.broadcast %c15_i32 : i32 to vector<32x1xi32>
    %20 = arith.cmpi eq, %16, %19 : vector<32x1xi32>
    %c14_i32 = arith.constant 14 : i32
    %21 = vector.broadcast %c14_i32 : i32 to vector<32x1xi32>
    %22 = arith.cmpi sge, %16, %21 : vector<32x1xi32>
    %c0 = arith.constant 0 : index
    %c0_4 = arith.constant 0 : index
    %23 = vector.load %arg9[%c0, %c0_4] : memref<8x128xf32, #tpu.memory_space<vmem>>, vector<1x128xf32>
    %c1 = arith.constant 1 : index
    %c0_5 = arith.constant 0 : index
    %24 = vector.load %arg9[%c1, %c0_5] : memref<8x128xf32, #tpu.memory_space<vmem>>, vector<1x128xf32>
    %c2 = arith.constant 2 : index
    %c0_6 = arith.constant 0 : index
    %25 = vector.load %arg9[%c2, %c0_6] : memref<8x128xf32, #tpu.memory_space<vmem>>, vector<1x128xf32>
    %c3 = arith.constant 3 : index
    %c0_7 = arith.constant 0 : index
    %26 = vector.load %arg9[%c3, %c0_7] : memref<8x128xf32, #tpu.memory_space<vmem>>, vector<1x128xf32>
    %c4 = arith.constant 4 : index
    %c0_8 = arith.constant 0 : index
    %27 = vector.load %arg9[%c4, %c0_8] : memref<8x128xf32, #tpu.memory_space<vmem>>, vector<1x128xf32>
    %c5 = arith.constant 5 : index
    %c0_9 = arith.constant 0 : index
    %28 = vector.load %arg9[%c5, %c0_9] : memref<8x128xf32, #tpu.memory_space<vmem>>, vector<1x128xf32>
    %c6 = arith.constant 6 : index
    %c0_10 = arith.constant 0 : index
    %29 = vector.load %arg9[%c6, %c0_10] : memref<8x128xf32, #tpu.memory_space<vmem>>, vector<1x128xf32>
    %c7 = arith.constant 7 : index
    %c0_11 = arith.constant 0 : index
    %30 = vector.load %arg9[%c7, %c0_11] : memref<8x128xf32, #tpu.memory_space<vmem>>, vector<1x128xf32>
    %c0_12 = arith.constant 0 : index
    %c0_13 = arith.constant 0 : index
    %31 = vector.load %arg1[%c0_12, %c0_13] : memref<32x128xf32, #tpu.memory_space<vmem>>, vector<32x128xf32>
    %c1_i32_14 = arith.constant 1 : i32
    %32 = tpu.dynamic_rotate %31 by %c1_i32_14 dim 0 : vector<32x128xf32>, i32 -> vector<32x128xf32>
    %cst = arith.constant 0.000000e+00 : f32
    %33 = vector.shape_cast %18 : vector<32x1xi1> to vector<32x1xi1>
    %34 = vector.broadcast %33 : vector<32x1xi1> to vector<32x128xi1>
    %35 = vector.broadcast %cst : f32 to vector<32x128xf32>
    %36 = arith.select %34, %35, %32 : vector<32x128xi1>, vector<32x128xf32>
    %c31_i32 = arith.constant 31 : i32
    %37 = tpu.dynamic_rotate %31 by %c31_i32 dim 0 : vector<32x128xf32>, i32 -> vector<32x128xf32>
    %cst_15 = arith.constant 0.000000e+00 : f32
    %38 = vector.shape_cast %20 : vector<32x1xi1> to vector<32x1xi1>
    %39 = vector.broadcast %38 : vector<32x1xi1> to vector<32x128xi1>
    %40 = vector.broadcast %cst_15 : f32 to vector<32x128xf32>
    %41 = arith.select %39, %40, %37 : vector<32x128xi1>, vector<32x128xf32>
    %42 = tpu.concatenate %36, %31, %41 in 1 : vector<32x128xf32>, vector<32x128xf32>, vector<32x128xf32> -> vector<32x384xf32>
    %c0_16 = arith.constant 0 : index
    %c0_17 = arith.constant 0 : index
    %43 = vector.load %arg3[%c0_16, %c0_17] : memref<384x128xf32, #tpu.memory_space<vmem>>, vector<384x128xf32>
    %cst_18 = arith.constant dense<0.000000e+00> : vector<32x128xf32>
    %44 = tpu.matmul %42, %43, %cst_18 {dimension_numbers = #tpu.dot_dimension_numbers<[1], [0], [0], [1], [0, 0, 1, 1], [], []>} : vector<32x384xf32>, vector<384x128xf32>, vector<32x128xf32> -> vector<32x128xf32>
    %45 = vector.broadcast %23 : vector<1x128xf32> to vector<32x128xf32>
    %46 = arith.addf %44, %45 : vector<32x128xf32>
    %cst_19 = arith.constant 0.000000e+00 : f32
    %47 = vector.broadcast %cst_19 : f32 to vector<32x128xf32>
    %48 = arith.maximumf %46, %47 : vector<32x128xf32>
    %cst_20 = arith.constant dense<0.000000e+00> : vector<128xf32>
    %49 = vector.multi_reduction <add>, %48, %cst_20 [0] : vector<32x128xf32> to vector<128xf32>
    %50 = vector.shape_cast %49 : vector<128xf32> to vector<1x128xf32>
    %c0_21 = arith.constant 0 : index
    %c0_22 = arith.constant 0 : index
    %51 = vector.load %arg7[%c0_21, %c0_22] : memref<128x128xf32, #tpu.memory_space<vmem>>, vector<128x128xf32>
    %cst_23 = arith.constant dense<0.000000e+00> : vector<1x128xf32>
    %52 = tpu.matmul %50, %51, %cst_23 {dimension_numbers = #tpu.dot_dimension_numbers<[1], [0], [0], [1], [0, 0, 1, 1], [], []>} : vector<1x128xf32>, vector<128x128xf32>, vector<1x128xf32> -> vector<1x128xf32>
    %cst_24 = arith.constant 0.001953125 : f32
    %53 = vector.broadcast %cst_24 : f32 to vector<1x128xf32>
    %54 = arith.mulf %52, %53 : vector<1x128xf32>
    %55 = vector.broadcast %54 : vector<1x128xf32> to vector<32x128xf32>
    %56 = arith.subf %48, %55 : vector<32x128xf32>
    %57 = arith.mulf %56, %56 : vector<32x128xf32>
    %cst_25 = arith.constant dense<0.000000e+00> : vector<128xf32>
    %58 = vector.multi_reduction <add>, %57, %cst_25 [0] : vector<32x128xf32> to vector<128xf32>
    %59 = vector.shape_cast %58 : vector<128xf32> to vector<1x128xf32>
    %c0_26 = arith.constant 0 : index
    %c0_27 = arith.constant 0 : index
    %60 = vector.load %arg7[%c0_26, %c0_27] : memref<128x128xf32, #tpu.memory_space<vmem>>, vector<128x128xf32>
    %cst_28 = arith.constant dense<0.000000e+00> : vector<1x128xf32>
    %61 = tpu.matmul %59, %60, %cst_28 {dimension_numbers = #tpu.dot_dimension_numbers<[1], [0], [0], [1], [0, 0, 1, 1], [], []>} : vector<1x128xf32>, vector<128x128xf32>, vector<1x128xf32> -> vector<1x128xf32>
    %cst_29 = arith.constant 0.001953125 : f32
    %62 = vector.broadcast %cst_29 : f32 to vector<1x128xf32>
    %63 = arith.mulf %61, %62 : vector<1x128xf32>
    %cst_30 = arith.constant 9.99999974E-6 : f32
    %64 = vector.broadcast %cst_30 : f32 to vector<1x128xf32>
    %65 = arith.addf %63, %64 : vector<1x128xf32>
    %66 = math.rsqrt %65 : vector<1x128xf32>
    %67 = arith.mulf %24, %66 : vector<1x128xf32>
    %68 = vector.broadcast %67 : vector<1x128xf32> to vector<32x128xf32>
    %69 = arith.mulf %56, %68 : vector<32x128xf32>
    %70 = vector.broadcast %25 : vector<1x128xf32> to vector<32x128xf32>
    %71 = arith.addf %69, %70 : vector<32x128xf32>
    %c0_31 = arith.constant 0 : index
    %c0_32 = arith.constant 0 : index
    %72 = vector.load %arg2[%c0_31, %c0_32] : memref<32x32xf32, #tpu.memory_space<vmem>>, vector<32x32xf32>
    %c0_33 = arith.constant 0 : index
    %c0_34 = arith.constant 0 : index
    %73 = vector.load %arg6[%c0_33, %c0_34] : memref<32x128xf32, #tpu.memory_space<vmem>>, vector<32x128xf32>
    %cst_35 = arith.constant dense<0.000000e+00> : vector<32x128xf32>
    %74 = tpu.matmul %72, %73, %cst_35 {dimension_numbers = #tpu.dot_dimension_numbers<[1], [0], [0], [1], [0, 0, 1, 1], [], []>} : vector<32x32xf32>, vector<32x128xf32>, vector<32x128xf32> -> vector<32x128xf32>
    %75 = vector.broadcast %26 : vector<1x128xf32> to vector<32x128xf32>
    %76 = arith.addf %74, %75 : vector<32x128xf32>
    %cst_36 = arith.constant 0.000000e+00 : f32
    %77 = vector.broadcast %cst_36 : f32 to vector<32x128xf32>
    %78 = arith.maximumf %76, %77 : vector<32x128xf32>
    %79 = arith.addf %71, %78 : vector<32x128xf32>
    %c1_i32_37 = arith.constant 1 : i32
    %80 = tpu.dynamic_rotate %79 by %c1_i32_37 dim 0 : vector<32x128xf32>, i32 -> vector<32x128xf32>
    %cst_38 = arith.constant 0.000000e+00 : f32
    %81 = vector.shape_cast %18 : vector<32x1xi1> to vector<32x1xi1>
    %82 = vector.broadcast %81 : vector<32x1xi1> to vector<32x128xi1>
    %83 = vector.broadcast %cst_38 : f32 to vector<32x128xf32>
    %84 = arith.select %82, %83, %80 : vector<32x128xi1>, vector<32x128xf32>
    %c31_i32_39 = arith.constant 31 : i32
    %85 = tpu.dynamic_rotate %79 by %c31_i32_39 dim 0 : vector<32x128xf32>, i32 -> vector<32x128xf32>
    %cst_40 = arith.constant 0.000000e+00 : f32
    %86 = vector.shape_cast %20 : vector<32x1xi1> to vector<32x1xi1>
    %87 = vector.broadcast %86 : vector<32x1xi1> to vector<32x128xi1>
    %88 = vector.broadcast %cst_40 : f32 to vector<32x128xf32>
    %89 = arith.select %87, %88, %85 : vector<32x128xi1>, vector<32x128xf32>
    %90 = tpu.concatenate %84, %79, %89 in 1 : vector<32x128xf32>, vector<32x128xf32>, vector<32x128xf32> -> vector<32x384xf32>
    %c0_41 = arith.constant 0 : index
    %c0_42 = arith.constant 0 : index
    %91 = vector.load %arg4[%c0_41, %c0_42] : memref<384x128xf32, #tpu.memory_space<vmem>>, vector<384x128xf32>
    %cst_43 = arith.constant dense<0.000000e+00> : vector<32x128xf32>
    %92 = tpu.matmul %90, %91, %cst_43 {dimension_numbers = #tpu.dot_dimension_numbers<[1], [0], [0], [1], [0, 0, 1, 1], [], []>} : vector<32x384xf32>, vector<384x128xf32>, vector<32x128xf32> -> vector<32x128xf32>
    %93 = vector.broadcast %27 : vector<1x128xf32> to vector<32x128xf32>
    %94 = arith.addf %92, %93 : vector<32x128xf32>
    %cst_44 = arith.constant 0.000000e+00 : f32
    %95 = vector.broadcast %cst_44 : f32 to vector<32x128xf32>
    %96 = arith.maximumf %94, %95 : vector<32x128xf32>
    %cst_45 = arith.constant dense<0.000000e+00> : vector<128xf32>
    %97 = vector.multi_reduction <add>, %96, %cst_45 [0] : vector<32x128xf32> to vector<128xf32>
    %98 = vector.shape_cast %97 : vector<128xf32> to vector<1x128xf32>
    %c0_46 = arith.constant 0 : index
    %c0_47 = arith.constant 0 : index
    %99 = vector.load %arg7[%c0_46, %c0_47] : memref<128x128xf32, #tpu.memory_space<vmem>>, vector<128x128xf32>
    %cst_48 = arith.constant dense<0.000000e+00> : vector<1x128xf32>
    %100 = tpu.matmul %98, %99, %cst_48 {dimension_numbers = #tpu.dot_dimension_numbers<[1], [0], [0], [1], [0, 0, 1, 1], [], []>} : vector<1x128xf32>, vector<128x128xf32>, vector<1x128xf32> -> vector<1x128xf32>
    %cst_49 = arith.constant 0.001953125 : f32
    %101 = vector.broadcast %cst_49 : f32 to vector<1x128xf32>
    %102 = arith.mulf %100, %101 : vector<1x128xf32>
    %103 = vector.broadcast %102 : vector<1x128xf32> to vector<32x128xf32>
    %104 = arith.subf %96, %103 : vector<32x128xf32>
    %105 = arith.mulf %104, %104 : vector<32x128xf32>
    %cst_50 = arith.constant dense<0.000000e+00> : vector<128xf32>
    %106 = vector.multi_reduction <add>, %105, %cst_50 [0] : vector<32x128xf32> to vector<128xf32>
    %107 = vector.shape_cast %106 : vector<128xf32> to vector<1x128xf32>
    %c0_51 = arith.constant 0 : index
    %c0_52 = arith.constant 0 : index
    %108 = vector.load %arg7[%c0_51, %c0_52] : memref<128x128xf32, #tpu.memory_space<vmem>>, vector<128x128xf32>
    %cst_53 = arith.constant dense<0.000000e+00> : vector<1x128xf32>
    %109 = tpu.matmul %107, %108, %cst_53 {dimension_numbers = #tpu.dot_dimension_numbers<[1], [0], [0], [1], [0, 0, 1, 1], [], []>} : vector<1x128xf32>, vector<128x128xf32>, vector<1x128xf32> -> vector<1x128xf32>
    %cst_54 = arith.constant 0.001953125 : f32
    %110 = vector.broadcast %cst_54 : f32 to vector<1x128xf32>
    %111 = arith.mulf %109, %110 : vector<1x128xf32>
    %cst_55 = arith.constant 9.99999974E-6 : f32
    %112 = vector.broadcast %cst_55 : f32 to vector<1x128xf32>
    %113 = arith.addf %111, %112 : vector<1x128xf32>
    %114 = math.rsqrt %113 : vector<1x128xf32>
    %115 = arith.mulf %28, %114 : vector<1x128xf32>
    %116 = vector.broadcast %115 : vector<1x128xf32> to vector<32x128xf32>
    %117 = arith.mulf %104, %116 : vector<32x128xf32>
    %118 = vector.broadcast %29 : vector<1x128xf32> to vector<32x128xf32>
    %119 = arith.addf %117, %118 : vector<32x128xf32>
    %c1_i32_56 = arith.constant 1 : i32
    %120 = tpu.dynamic_rotate %119 by %c1_i32_56 dim 0 : vector<32x128xf32>, i32 -> vector<32x128xf32>
    %cst_57 = arith.constant 0.000000e+00 : f32
    %121 = vector.shape_cast %18 : vector<32x1xi1> to vector<32x1xi1>
    %122 = vector.broadcast %121 : vector<32x1xi1> to vector<32x128xi1>
    %123 = vector.broadcast %cst_57 : f32 to vector<32x128xf32>
    %124 = arith.select %122, %123, %120 : vector<32x128xi1>, vector<32x128xf32>
    %c31_i32_58 = arith.constant 31 : i32
    %125 = tpu.dynamic_rotate %119 by %c31_i32_58 dim 0 : vector<32x128xf32>, i32 -> vector<32x128xf32>
    %cst_59 = arith.constant 0.000000e+00 : f32
    %126 = vector.shape_cast %20 : vector<32x1xi1> to vector<32x1xi1>
    %127 = vector.broadcast %126 : vector<32x1xi1> to vector<32x128xi1>
    %128 = vector.broadcast %cst_59 : f32 to vector<32x128xf32>
    %129 = arith.select %127, %128, %125 : vector<32x128xi1>, vector<32x128xf32>
    %c30_i32 = arith.constant 30 : i32
    %130 = tpu.dynamic_rotate %119 by %c30_i32 dim 0 : vector<32x128xf32>, i32 -> vector<32x128xf32>
    %cst_60 = arith.constant 0.000000e+00 : f32
    %131 = vector.shape_cast %22 : vector<32x1xi1> to vector<32x1xi1>
    %132 = vector.broadcast %131 : vector<32x1xi1> to vector<32x128xi1>
    %133 = vector.broadcast %cst_60 : f32 to vector<32x128xf32>
    %134 = arith.select %132, %133, %130 : vector<32x128xi1>, vector<32x128xf32>
    %135 = tpu.concatenate %124, %119, %129, %134 in 1 : vector<32x128xf32>, vector<32x128xf32>, vector<32x128xf32>, vector<32x128xf32> -> vector<32x512xf32>
    %c0_61 = arith.constant 0 : index
    %c0_62 = arith.constant 0 : index
    %136 = vector.load %arg8[%c0_61, %c0_62] : memref<16x32xf32, #tpu.memory_space<vmem>>, vector<16x32xf32>
    %cst_63 = arith.constant dense<0.000000e+00> : vector<16x512xf32>
    %137 = tpu.matmul %136, %135, %cst_63 {dimension_numbers = #tpu.dot_dimension_numbers<[1], [0], [0], [1], [0, 0, 1, 1], [], []>} : vector<16x32xf32>, vector<32x512xf32>, vector<16x512xf32> -> vector<16x512xf32>
    %c0_64 = arith.constant 0 : index
    %c0_65 = arith.constant 0 : index
    %138 = vector.load %arg5[%c0_64, %c0_65] : memref<512x128xf32, #tpu.memory_space<vmem>>, vector<512x128xf32>
    %cst_66 = arith.constant dense<0.000000e+00> : vector<16x128xf32>
    %139 = tpu.matmul %137, %138, %cst_66 {dimension_numbers = #tpu.dot_dimension_numbers<[1], [0], [0], [1], [0, 0, 1, 1], [], []>} : vector<16x512xf32>, vector<512x128xf32>, vector<16x128xf32> -> vector<16x128xf32>
    %140 = vector.broadcast %30 : vector<1x128xf32> to vector<16x128xf32>
    %141 = arith.addf %139, %140 : vector<16x128xf32>
    %c0_67 = arith.constant 0 : index
    %c0_68 = arith.constant 0 : index
    %142 = vector.load %arg10[%c0_67, %c0_68] : memref<16x128xf32, #tpu.memory_space<vmem>>, vector<16x128xf32>
    tpu.vector_store %arg10[%c0_67, %c0_68], %141 {strides = array<i32>} : memref<16x128xf32, #tpu.memory_space<vmem>>, vector<16x128xf32>,
    return
  }
  func.func @transform_0(%arg0: i32) -> (i32, i32) {
    %c0_i32 = arith.constant 0 : i32
    %c0_i32_0 = arith.constant 0 : i32
    %c0_i32_1 = arith.constant 0 : i32
    return %c0_i32, %c0_i32_0 : i32, i32
  }
  func.func @transform_1(%arg0: i32) -> (i32, i32) {
    %c0_i32 = arith.constant 0 : i32
    %c0_i32_0 = arith.constant 0 : i32
    %c0_i32_1 = arith.constant 0 : i32
    return %c0_i32, %c0_i32_0 : i32, i32
  }
  func.func @transform_2(%arg0: i32) -> (i32, i32) {
    %c0_i32 = arith.constant 0 : i32
    %c0_i32_0 = arith.constant 0 : i32
    %c0_i32_1 = arith.constant 0 : i32
    return %c0_i32, %c0_i32_0 : i32, i32
  }
  func.func @transform_3(%arg0: i32) -> (i32, i32) {
    %c0_i32 = arith.constant 0 : i32
    %c0_i32_0 = arith.constant 0 : i32
    %c0_i32_1 = arith.constant 0 : i32
    return %c0_i32, %c0_i32_0 : i32, i32
  }
  func.func @transform_4(%arg0: i32) -> (i32, i32) {
    %c0_i32 = arith.constant 0 : i32
    %c0_i32_0 = arith.constant 0 : i32
    %c0_i32_1 = arith.constant 0 : i32
    return %c0_i32, %c0_i32_0 : i32, i32
  }
  func.func @transform_5(%arg0: i32) -> (i32, i32) {
    %c0_i32 = arith.constant 0 : i32
    %c0_i32_0 = arith.constant 0 : i32
    %c0_i32_1 = arith.constant 0 : i32
    return %c0_i32, %c0_i32_0 : i32, i32
  }
  func.func @transform_6(%arg0: i32) -> (i32, i32) {
    %c0_i32 = arith.constant 0 : i32
    %c0_i32_0 = arith.constant 0 : i32
    %c0_i32_1 = arith.constant 0 : i32
    return %c0_i32, %c0_i32_0 : i32, i32
  }
  func.func @transform_7(%arg0: i32) -> (i32, i32) {
    %c0_i32 = arith.constant 0 : i32
    %c0_i32_0 = arith.constant 0 : i32
    %c0_i32_1 = arith.constant 0 : i32
    return %c0_i32, %c0_i32_0 : i32, i32
  }
  func.func @transform_8(%arg0: i32) -> (i32, i32) {
    %c0_i32 = arith.constant 0 : i32
    %c0_i32_0 = arith.constant 0 : i32
    %c0_i32_1 = arith.constant 0 : i32
    return %c0_i32, %c0_i32_0 : i32, i32
  }
  func.func @transform_9(%arg0: i32) -> (i32, i32) {
    %c0_i32 = arith.constant 0 : i32
    %c0_i32_0 = arith.constant 0 : i32
    %c0_i32_1 = arith.constant 0 : i32
    return %c0_i32, %c0_i32_0 : i32, i32
  }
}

</mosaic_0001>

<bundles_post_ra>
// kernel: tile.53
= control target key start
LH: loop header
LB: loop body
LE: loop exit
PB: predicated region body
PF: predicated region fallthrough
CT: control target
= control target key end

     0   :  { %s28_s0 = inlined_call_operand.vmem [shape: f32[8], index: 0, kind: input, shape index: {}]   ;;  %s29_s1 = inlined_call_operand.vmem [shape: f32[16,8], index: 1, kind: output, shape index: {}]  }
   0x1   :  { %v4_v0 = vld [vmem:[%s28_s0] ss:$0 sm:$0xff] }
   0x2   :  { %5 = vst [vmem:[%s29_s1] sm:$0xff] %v4_v0  ;;  %8 = vst [vmem:[%s29_s1 + $0x8] sm:$0xff] %v4_v0 }

// kernel: tile.83
= control target key start
LH: loop header
LB: loop body
LE: loop exit
PB: predicated region body
PF: predicated region fallthrough
CT: control target
= control target key end

     0   :  { %s131_s10 = smov 120   ;;  %s132_s11 = smov 104   ;;  %vm3_vm0 = vcmask 64512   ;;  %vm9_vm1 = vcmask 1048512   ;;  %vm15_vm2 = vcmask 982912   ;;  %vm21_vm3 = vcmask 917312   ;;  %s207_s0 = inlined_call_operand.vmem [shape: f32[16,8], index: 0, kind: input, shape index: {}]   ;;  %s208_s1 = inlined_call_operand.vmem [shape: f32[1,128], index: 1, kind: output, shape index: {}]  }
   0x1   :  { %v101_v0 = vld [vmem:[%s207_s0 + $0xf] sm:$0x1]   ;;  %v103_v1 = vld [vmem:[%s207_s0 + $0xd] sm:$0x1]   ;;  %v102_v2 = vld [vmem:[%s207_s0 + $0xe] sm:$0x1]  }
   0x2   :  { %7 = vrot.lane.b32.xlu0 %v101_v0, %s131_s10  ;;  %19 = vrot.lane.b32.xlu1 %v103_v1, %s132_s11  ;;  %v104_v3 = vld [vmem:[%s207_s0 + $0xc] sm:$0x1]   ;;  %s133_s16 = smov 112   ;;  %s134_s17 = smov 96   ;;  %v105_v4 = vld [vmem:[%s207_s0 + $0xb] sm:$0x1]  }
   0x3   :  { %v106_v5 = vld [vmem:[%s207_s0 + $0xa] sm:$0x1]   ;;  %v2_v6 = vld [vmem:[%s207_s0] sm:$0x1]   ;;  %s135_s24 = smov 88   ;;  %s136_s25 = smov 80  }
   0x4   :  { %4 = vst.msk [vmem:[#allocation0] sm:$0x1] %vm3_vm0, %v2_v6   ;;  %v107_v7 = vld [vmem:[%s207_s0 + $0x9] sm:$0x1]   ;;  %v108_v8 = vld [vmem:[%s207_s0 + $0x8] sm:$0x1]  }
   0x5   :  { %s137_s30 = smov 72   ;;  %s138_s2 = smov 64   ;;  %v109_v9 = vld [vmem:[%s207_s0 + $0x7] sm:$0x1]   ;;  %v110_v10 = vld [vmem:[%s207_s0 + $0x6] sm:$0x1]  }
   0x6   :  { %13 = vrot.lane.b32.xlu0 %v102_v2, %s133_s16  ;;  %25 = vrot.lane.b32.xlu1 %v104_v3, %s134_s17  ;;  %s139_s7 = smov 56   ;;  %s140_s8 = smov 48   ;;  %v111_v11 = vld [vmem:[%s207_s0 + $0x5] sm:$0x1]   ;;  %v112_v12 = vld [vmem:[%s207_s0 + $0x4] sm:$0x1]  }
   0x7   :  { %s141_s13 = smov 40   ;;  %s142_s14 = smov 32   ;;  %v113_v13 = vld [vmem:[%s207_s0 + $0x3] sm:$0x1]   ;;  %v114_v14 = vld [vmem:[%s207_s0 + $0x2] sm:$0x1]  }
   0x8   :  { %s143_s19 = smov 24   ;;  %s144_s20 = smov 16   ;;  %v115_v15 = vld [vmem:[%s207_s0 + $0x1] sm:$0x1]   ;;  %vm27_vm4 = vcmask 851712   ;;  %vm33_vm5 = vcmask 786112  }
   0x9   :  { %s145_s0 = smov 8   ;;  %vm39_vm6 = vcmask 720512   ;;  %vm45_vm7 = vcmask 654912   ;;  %vm51_vm8 = vcmask 589312   ;;  %vm57_vm9 = vcmask 523712  }
   0xa   :  { %31 = vrot.lane.b32.xlu0 %v105_v4, %s135_s24  ;;  %37 = vrot.lane.b32.xlu1 %v106_v5, %s136_s25  ;;  %vm63_vm10 = vcmask 458112   ;;  %vm69_vm11 = vcmask 392512   ;;  %vm75_vm12 = vcmask 326912   ;;  %vm81_vm13 = vcmask 261312  }
   0xb   :  { %vm87_vm14 = vcmask 195712   ;;  %vm93_vm15 = vcmask 130112  }
   0xe   :  { %43 = vrot.lane.b32.xlu0 %v107_v7, %s137_s30  ;;  %49 = vrot.lane.b32.xlu1 %v108_v8, %s138_s2 }
  0x12   :  { %55 = vrot.lane.b32.xlu0 %v109_v9, %s139_s7  ;;  %61 = vrot.lane.b32.xlu1 %v110_v10, %s140_s8 }
  0x16   :  { %67 = vrot.lane.b32.xlu0 %v111_v11, %s141_s13  ;;  %73 = vrot.lane.b32.xlu1 %v112_v12, %s142_s14 }
  0x1a   :  { %79 = vrot.lane.b32.xlu0 %v113_v13, %s143_s19  ;;  %85 = vrot.lane.b32.xlu1 %v114_v14, %s144_s20 }
  0x1e   :  { %91 = vrot.lane.b32.xlu0 %v115_v15, %s145_s0 }
  0x74   :  { %v8_v16 = vpop.permute.xlu0 %7   ;;  %v20_v17 = vpop.permute.xlu1 %19  }
  0x75   :  { %10 = vst.msk [vmem:[#allocation0] sm:$0x1] %vm9_vm1, %v8_v16  }
  0x78   :  { %v14_v18 = vpop.permute.xlu0 %13   ;;  %v26_v19 = vpop.permute.xlu1 %25  }
  0x79   :  { %16 = vst.msk [vmem:[#allocation0] sm:$0x1] %vm15_vm2, %v14_v18  }
  0x7a   :  { %22 = vst.msk [vmem:[#allocation0] sm:$0x1] %vm21_vm3, %v20_v17  }
  0x7b   :  { %28 = vst.msk [vmem:[#allocation0] sm:$0x1] %vm27_vm4, %v26_v19  }
  0x7c   :  { %v32_v20 = vpop.permute.xlu0 %31   ;;  %v38_v21 = vpop.permute.xlu1 %37  }
  0x7d   :  { %34 = vst.msk [vmem:[#allocation0] sm:$0x1] %vm33_vm5, %v32_v20  }
  0x7e   :  { %40 = vst.msk [vmem:[#allocation0] sm:$0x1] %vm39_vm6, %v38_v21  }
  0x80   :  { %v44_v22 = vpop.permute.xlu0 %43   ;;  %v50_v23 = vpop.permute.xlu1 %49  }
  0x81   :  { %46 = vst.msk [vmem:[#allocation0] sm:$0x1] %vm45_vm7, %v44_v22  }
  0x82   :  { %52 = vst.msk [vmem:[#allocation0] sm:$0x1] %vm51_vm8, %v50_v23  }
  0x84   :  { %v56_v24 = vpop.permute.xlu0 %55   ;;  %v62_v25 = vpop.permute.xlu1 %61  }
  0x85   :  { %58 = vst.msk [vmem:[#allocation0] sm:$0x1] %vm57_vm9, %v56_v24  }
  0x86   :  { %64 = vst.msk [vmem:[#allocation0] sm:$0x1] %vm63_vm10, %v62_v25  }
  0x88   :  { %v68_v26 = vpop.permute.xlu0 %67   ;;  %v74_v27 = vpop.permute.xlu1 %73  }
  0x89   :  { %70 = vst.msk [vmem:[#allocation0] sm:$0x1] %vm69_vm11, %v68_v26  }
  0x8a   :  { %76 = vst.msk [vmem:[#allocation0] sm:$0x1] %vm75_vm12, %v74_v27  }
  0x8c   :  { %v80_v28 = vpop.permute.xlu0 %79   ;;  %v86_v29 = vpop.permute.xlu1 %85  }
  0x8d   :  { %82 = vst.msk [vmem:[#allocation0] sm:$0x1] %vm81_vm13, %v80_v28  }
  0x8e   :  { %88 = vst.msk [vmem:[#allocation0] sm:$0x1] %vm87_vm14, %v86_v29  }
  0x90   :  { %v92_v30 = vpop.permute.xlu0 %91  }
  0x91   :  { %94 = vst.msk [vmem:[#allocation0] sm:$0x1] %vm93_vm15, %v92_v30  }
  0x98   :  { %v98_v31 = vld [vmem:[#allocation0] sm:$0x1] }
  0x99   :  { %100 = vst [vmem:[%s208_s1] sm:$0x1] %v98_v31 }

// kernel: tile.81
= control target key start
LH: loop header
LB: loop body
LE: loop exit
PB: predicated region body
PF: predicated region fallthrough
CT: control target
= control target key end

     0   :  { %s22_s0 = inlined_call_operand.vmem [shape: f32[8], index: 0, kind: input, shape index: {}]   ;;  %s23_s1 = inlined_call_operand.vmem [shape: f32[8,8], index: 1, kind: output, shape index: {}]  }
   0x1   :  { %v4_v0 = vld [vmem:[%s22_s0] ss:$0 sm:$0xff] }
   0x2   :  { %5 = vst [vmem:[%s23_s1] sm:$0xff] %v4_v0 }

// kernel: tile.82
= control target key start
LH: loop header
LB: loop body
LE: loop exit
PB: predicated region body
PF: predicated region fallthrough
CT: control target
= control target key end

     0   :  { %s67_s10 = smov 56   ;;  %s68_s11 = smov 40   ;;  %vm3_vm0 = vcmask 64512   ;;  %vm9_vm1 = vcmask 523712   ;;  %vm15_vm2 = vcmask 458112   ;;  %vm21_vm3 = vcmask 392512   ;;  %s111_s0 = inlined_call_operand.vmem [shape: f32[8,8], index: 0, kind: input, shape index: {}]   ;;  %s112_s1 = inlined_call_operand.vmem [shape: f32[64], index: 1, kind: output, shape index: {}]  }
   0x1   :  { %v53_v0 = vld [vmem:[%s111_s0 + $0x7] sm:$0x1]   ;;  %v55_v1 = vld [vmem:[%s111_s0 + $0x5] sm:$0x1]   ;;  %v54_v2 = vld [vmem:[%s111_s0 + $0x6] sm:$0x1]  }
   0x2   :  { %7 = vrot.lane.b32.xlu0 %v53_v0, %s67_s10  ;;  %19 = vrot.lane.b32.xlu1 %v55_v1, %s68_s11  ;;  %v56_v3 = vld [vmem:[%s111_s0 + $0x4] sm:$0x1]   ;;  %v2_v4 = vld [vmem:[%s111_s0] sm:$0x1]   ;;  %s69_s18 = smov 48   ;;  %s70_s19 = smov 32  }
   0x3   :  { %4 = vst.msk [vmem:[#allocation0] sm:$0x1] %vm3_vm0, %v2_v4   ;;  %v57_v5 = vld [vmem:[%s111_s0 + $0x3] sm:$0x1]   ;;  %v58_v6 = vld [vmem:[%s111_s0 + $0x2] sm:$0x1]  }
   0x4   :  { %s71_s24 = smov 24   ;;  %s72_s25 = smov 16   ;;  %v59_v7 = vld [vmem:[%s111_s0 + $0x1] sm:$0x1]   ;;  %vm27_vm4 = vcmask 326912   ;;  %vm33_vm5 = vcmask 261312  }
   0x5   :  { %s73_s0 = smov 8   ;;  %vm39_vm6 = vcmask 195712   ;;  %vm45_vm7 = vcmask 130112  }
   0x6   :  { %13 = vrot.lane.b32.xlu0 %v54_v2, %s69_s18  ;;  %25 = vrot.lane.b32.xlu1 %v56_v3, %s70_s19 }
   0xa   :  { %31 = vrot.lane.b32.xlu0 %v57_v5, %s71_s24  ;;  %37 = vrot.lane.b32.xlu1 %v58_v6, %s72_s25 }
   0xe   :  { %43 = vrot.lane.b32.xlu0 %v59_v7, %s73_s0 }
  0x74   :  { %v8_v8 = vpop.permute.xlu0 %7   ;;  %v20_v9 = vpop.permute.xlu1 %19  }
  0x75   :  { %10 = vst.msk [vmem:[#allocation0] sm:$0x1] %vm9_vm1, %v8_v8  }
  0x78   :  { %v14_v10 = vpop.permute.xlu0 %13   ;;  %v26_v11 = vpop.permute.xlu1 %25  }
  0x79   :  { %16 = vst.msk [vmem:[#allocation0] sm:$0x1] %vm15_vm2, %v14_v10  }
  0x7a   :  { %22 = vst.msk [vmem:[#allocation0] sm:$0x1] %vm21_vm3, %v20_v9  }
  0x7b   :  { %28 = vst.msk [vmem:[#allocation0] sm:$0x1] %vm27_vm4, %v26_v11  }
  0x7c   :  { %v32_v12 = vpop.permute.xlu0 %31   ;;  %v38_v13 = vpop.permute.xlu1 %37  }
  0x7d   :  { %34 = vst.msk [vmem:[#allocation0] sm:$0x1] %vm33_vm5, %v32_v12  }
  0x7e   :  { %40 = vst.msk [vmem:[#allocation0] sm:$0x1] %vm39_vm6, %v38_v13  }
  0x80   :  { %v44_v14 = vpop.permute.xlu0 %43  }
  0x81   :  { %46 = vst.msk [vmem:[#allocation0] sm:$0x1] %vm45_vm7, %v44_v14  }
  0x88   :  { %v50_v15 = vld [vmem:[#allocation0] sm:$0x1] }
  0x89   :  { %52 = vst [vmem:[%s112_s1] sm:$0x1] %v50_v15 }

// kernel: block_forward.1
= control target key start
LH: loop header
LB: loop body
LE: loop exit
PB: predicated region body
PF: predicated region fallthrough
CT: control target
= control target key end

     0   :  { %v32_v37 = vlaneseq  ;;  %vm2459_vm6 = vmmov 0   ;;  %vm596_vm7 = vcmask 261120   ;;  %vm2461_vm11 = vmmov 1   ;;  %s3405_s2 = inlined_call_operand.vmem [shape: f32[384,128], index: 2, kind: input, shape index: {}]   ;;  %s3406_s0 = inlined_call_operand.vmem [shape: f32[32,128], index: 0, kind: input, shape index: {}]   ;;  %s3407_s6 = inlined_call_operand.vmem [shape: f32[128,128], index: 6, kind: input, shape index: {}]   ;;  %s3408_s8 = inlined_call_operand.vmem [shape: f32[8,128], index: 8, kind: input, shape index: {}]   ;;  %s3409_s5 = inlined_call_operand.vmem [shape: f32[32,128], index: 5, kind: input, shape index: {}]   ;;  %s3410_s1 = inlined_call_operand.vmem [shape: f32[32,32], index: 1, kind: input, shape index: {}]   ;;  %s3411_s3 = inlined_call_operand.vmem [shape: f32[384,128], index: 3, kind: input, shape index: {}]   ;;  %s3412_s4 = inlined_call_operand.vmem [shape: f32[512,128], index: 4, kind: input, shape index: {}]   ;;  %s3413_s7 = inlined_call_operand.vmem [shape: f32[16,32], index: 7, kind: input, shape index: {}]   ;;  %s3414_s9 = inlined_call_operand.vmem [shape: f32[16,128], index: 9, kind: output, shape index: {}]  }
   0x1   :  { %v167_v0 = vld [vmem:[%s3405_s2 + $0x80] sm:$0xff]  ;;  %v168_v1 = vld [vmem:[%s3405_s2 + $0x88] sm:$0xff]  ;;  %v169_v5 = vld [vmem:[%s3405_s2 + $0x90] sm:$0xff] }
   0x2   :  { %v151_v2 = vld [vmem:[%s3405_s2] sm:$0xff]  ;;  %v2132_v3 = vpack.c.bf16 %v168_v1, %v167_v0  ;;  %v152_v4 = vld [vmem:[%s3405_s2 + $0x8] sm:$0xff]  ;;  %v170_v6 = vld [vmem:[%s3405_s2 + $0x98] sm:$0xff]  ;;  %v2613_v48 = vshrl.u32 %v32_v37, 7 }
   0x3   :  { %v2134_v7 = vpack.c.bf16 %v152_v4, %v151_v2  ;;  %v2136_v8 = vpack.c.bf16 %v170_v6, %v169_v5  ;;  %v183_v9 = vld [vmem:[%s3405_s2 + $0x100] sm:$0xff]  ;;  %v184_v10 = vld [vmem:[%s3405_s2 + $0x108] sm:$0xff]  ;;  %v153_v11 = vld [vmem:[%s3405_s2 + $0x10] sm:$0xff] }
   0x4   :  { %2133 = vmatprep.subr.bf16.mxu0 %v2132_v3  ;;  %v2164_v12 = vpack.c.bf16 %v184_v10, %v183_v9  ;;  %v154_v13 = vld [vmem:[%s3405_s2 + $0x18] sm:$0xff]  ;;  %v171_v14 = vld [vmem:[%s3405_s2 + $0xa0] sm:$0xff]  ;;  %v172_v15 = vld [vmem:[%s3405_s2 + $0xa8] sm:$0xff]  ;;  %vm134_vm0 = vcmp.lt.s32.totalorder %v2613_v48, 7  ;;  %vm113_vm1 = vcmp.lt.s32.totalorder %v2613_v48, 1  ;;  %vm1171_vm8 = vcmp.lt.s32.totalorder %v2613_v48, 6 }
   0x5   :  { %2135 = vmatpush3.bf16.msra.mxu0 %v2134_v7  ;;  %v2138_v16 = vpack.c.bf16 %v154_v13, %v153_v11  ;;  %v185_v17 = vld [vmem:[%s3405_s2 + $0x110] sm:$0xff]  ;;  %v186_v18 = vld [vmem:[%s3405_s2 + $0x118] sm:$0xff]  ;;  %v2140_v19 = vpack.c.bf16 %v172_v15, %v171_v14  ;;  %v155_v21 = vld [vmem:[%s3405_s2 + $0x20] sm:$0xff]  ;;  %v2680_v14 = vadd.s32 8, %v2613_v48 }
   0x6   :  { %2137 = vmatprep.subr.bf16.mxu0 %v2136_v8  ;;  %2165 = vmatprep.subr.bf16.mxu1 %v2164_v12  ;;  %v2168_v20 = vpack.c.bf16 %v186_v18, %v185_v17  ;;  %v156_v22 = vld [vmem:[%s3405_s2 + $0x28] sm:$0xff]  ;;  %v173_v23 = vld [vmem:[%s3405_s2 + $0xb0] sm:$0xff]  ;;  %v174_v24 = vld [vmem:[%s3405_s2 + $0xb8] sm:$0xff] }
   0x7   :  { %2167 = vmatpush3.bf16.msra.mxu1 %v2164_v12  ;;  %v187_v25 = vld [vmem:[%s3405_s2 + $0x120] sm:$0xff]  ;;  %v188_v26 = vld [vmem:[%s3405_s2 + $0x128] sm:$0xff]  ;;  %v2142_v28 = vpack.c.bf16 %v156_v22, %v155_v21  ;;  %v189_v29 = vld [vmem:[%s3405_s2 + $0x130] sm:$0xff]  ;;  %v2144_v31 = vpack.c.bf16 %v174_v24, %v173_v23  ;;  %v48_v21 = vand.u32 15, %v2680_v14  ;;  %v2690_v23 = vadd.s32 24, %v2613_v48 }
   0x8   :  { %2169 = vmatprep.subr.bf16.mxu1 %v2168_v20  ;;  %v2172_v27 = vpack.c.bf16 %v188_v26, %v187_v25  ;;  %v190_v30 = vld [vmem:[%s3405_s2 + $0x138] sm:$0xff]  ;;  %v157_v32 = vld [vmem:[%s3405_s2 + $0x30] sm:$0xff]  ;;  %v175_v34 = vld [vmem:[%s3405_s2 + $0xc0] sm:$0xff] }
   0x9   :  { %2139 = vmatpush3.bf16.msra.mxu0 %v2138_v16  ;;  %v158_v33 = vld [vmem:[%s3405_s2 + $0x38] sm:$0xff]  ;;  %v176_v35 = vld [vmem:[%s3405_s2 + $0xc8] sm:$0xff]  ;;  %v2176_v36 = vpack.c.bf16 %v190_v30, %v189_v29  ;;  %v191_v39 = vld [vmem:[%s3405_s2 + $0x140] sm:$0xff]  ;;  %vm2704_vm3 = vcmp.ne.s32.totalorder %v48_v21, 15  ;;  %vm3128_vm9 = vcmp.lt.s32.totalorder %v48_v21, 14 }
   0xa   :  { %2141 = vmatprep.subr.bf16.mxu0 %v2140_v19  ;;  %v2146_v38 = vpack.c.bf16 %v158_v33, %v157_v32  ;;  %v192_v40 = vld [vmem:[%s3405_s2 + $0x148] sm:$0xff]  ;;  %v2148_v41 = vpack.c.bf16 %v176_v35, %v175_v34  ;;  %v159_v42 = vld [vmem:[%s3405_s2 + $0x40] sm:$0xff]  ;;  %v177_v44 = vld [vmem:[%s3405_s2 + $0xd0] sm:$0xff]  ;;  %v41_v19 = vand.u32 15, %v2613_v48 }
   0xb   :  { %2171 = vmatpush3.bf16.msra.mxu1 %v2168_v20  ;;  %v160_v43 = vld [vmem:[%s3405_s2 + $0x48] sm:$0xff]  ;;  %v178_v45 = vld [vmem:[%s3405_s2 + $0xd8] sm:$0xff]  ;;  %v2180_v46 = vpack.c.bf16 %v192_v40, %v191_v39  ;;  %v2611_v47 = vld [vmem:[%s3406_s0] sm:$0xff] }
   0xc   :  { %2173 = vmatprep.subr.bf16.mxu1 %v2172_v27  ;;  %v2150_v49 = vpack.c.bf16 %v160_v43, %v159_v42  ;;  %v193_v50 = vld [vmem:[%s3405_s2 + $0x150] sm:$0xff]  ;;  %v194_v51 = vld [vmem:[%s3405_s2 + $0x158] sm:$0xff]  ;;  %v130_v52 = vrot.slane %v2611_v47, 1  ;;  %267 = vmatprep.mubr.f32.mxu0 %v2611_v47  ;;  %v2152_v53 = vpack.c.bf16 %v178_v45, %v177_v44  ;;  %v2632_v56 = vld [vmem:[%s3406_s0 + $0x8] sm:$0xff]  ;;  %v109_v18 = vrot.slane %v2611_v47, 7 }
   0xd   :  { %2143 = vmatpush3.bf16.msra.mxu0 %v2142_v28  ;;  %v161_v54 = vld [vmem:[%s3405_s2 + $0x50] sm:$0xff]  ;;  %v162_v55 = vld [vmem:[%s3405_s2 + $0x58] sm:$0xff]  ;;  %v179_v57 = vld [vmem:[%s3405_s2 + $0xe0] sm:$0xff]  ;;  %v131_v59 = vrot.slane %v2632_v56, 1  ;;  %v2184_v60 = vpack.c.bf16 %v194_v51, %v193_v50  ;;  %vm2694_vm2 = vcmp.ne.s32.totalorder %v41_v19, 0  ;;  %v35_v28 = vadd.s32 16, %v2613_v48 }
   0xe   :  { %2145 = vmatprep.subr.bf16.mxu0 %v2144_v31  ;;  %v180_v58 = vld [vmem:[%s3405_s2 + $0xe8] sm:$0xff]  ;;  %v2154_v61 = vpack.c.bf16 %v162_v55, %v161_v54  ;;  %v195_v62 = vld [vmem:[%s3405_s2 + $0x160] sm:$0xff]  ;;  %v181_v4 = vld [vmem:[%s3405_s2 + $0xf0] sm:$0xff]  ;;  %v62_v31 = vand.u32 15, %v2690_v23  ;;  %v2458_v44 = vmov 0.0|0.0  }
   0xf   :  { %2175 = vmatpush3.bf16.msra.mxu1 %v2172_v27  ;;  %v196_v63 = vld [vmem:[%s3405_s2 + $0x168] sm:$0xff]  ;;  %v137_v0 = vsel %vm134_vm0, %v130_v52, %v131_v59  ;;  %v2156_v1 = vpack.c.bf16 %v180_v58, %v179_v57  ;;  %v163_v2 = vld [vmem:[%s3405_s2 + $0x60] sm:$0xff]  ;;  %v182_v5 = vld [vmem:[%s3405_s2 + $0xf8] sm:$0xff]  ;;  %v110_v27 = vrot.slane %v2632_v56, 7  ;;  %v55_v34 = vand.u32 15, %v35_v28 }
  0x10   :  { %2177 = vmatprep.subr.bf16.mxu1 %v2176_v36  ;;  %v164_v3 = vld [vmem:[%s3405_s2 + $0x68] sm:$0xff]  ;;  %1934 = vmatprep.mubr.f32.mxu1 %v137_v0  ;;  %v2188_v6 = vpack.c.bf16 %v196_v63, %v195_v62  ;;  %v197_v8 = vld [vmem:[%s3405_s2 + $0x170] sm:$0xff]  ;;  %v198_v9 = vld [vmem:[%s3405_s2 + $0x178] sm:$0xff]  ;;  %v2160_v10 = vpack.c.bf16 %v182_v5, %v181_v4  ;;  %vm2724_vm4 = vcmp.ne.s32.totalorder %v62_v31, 15  ;;  %vm3134_vm10 = vcmp.lt.s32.totalorder %v62_v31, 14 }
  0x11   :  { %2147 = vmatpush3.bf16.msra.mxu0 %v2146_v38  ;;  %v2158_v7 = vpack.c.bf16 %v164_v3, %v163_v2  ;;  %v165_v11 = vld [vmem:[%s3405_s2 + $0x70] sm:$0xff]  ;;  %v166_v12 = vld [vmem:[%s3405_s2 + $0x78] sm:$0xff]  ;;  %v2192_v16 = vpack.c.bf16 %v198_v9, %v197_v8  ;;  %v116_v33 = vsel %vm113_vm1, %v109_v18, %v110_v27  ;;  %vm2730_vm5 = vcmp.ne.s32.totalorder %v55_v34, 0  ;;  %v387_v42 = vld [vmem:[%s3407_s6 + $0x8] sm:$0xff] }
  0x12   :  { %2149 = vmatprep.subr.bf16.mxu0 %v2148_v41  ;;  %v108_v13 = vld [vmem:[%s3406_s0 + $0x18] sm:$0xff]  ;;  %v107_v15 = vld [vmem:[%s3406_s0 + $0x10] sm:$0xff]  ;;  %v2162_v17 = vpack.c.bf16 %v166_v12, %v165_v11  ;;  %v386_v41 = vld [vmem:[%s3407_s6] sm:$0xff]  ;;  %v2460_v3 = vmov 0.0  }
  0x13   :  { %2179 = vmatpush3.bf16.msra.mxu1 %v2176_v36  ;;  %v112_v20 = vrot.slane %v108_v13, 7  ;;  %v132_v22 = vrot.slane %v107_v15, 1  ;;  %v133_v24 = vrot.slane %v108_v13, 1  ;;  %v111_v35 = vrot.slane %v107_v15, 7  ;;  %v388_v45 = vld [vmem:[%s3407_s6 + $0x10] sm:$0xff]  ;;  %v391_v50 = vld [vmem:[%s3407_s6 + $0x28] sm:$0xff]  ;;  %vm2367_vm12 = vmpackc.low %vm2461_vm11, %vm2694_vm2 }
  0x14   :  { %2181 = vmatprep.subr.bf16.mxu1 %v2180_v46  ;;  %v2746_v43 = vpack.c.bf16 %v387_v42, %v386_v41  ;;  %v394_v55 = vld [vmem:[%s3407_s6 + $0x40] sm:$0xff]  ;;  %v396_v58 = vld [vmem:[%s3407_s6 + $0x50] sm:$0xff]  ;;  %v399_v62 = vld [vmem:[%s3407_s6 + $0x68] sm:$0xff] }
  0x15   :  { %2151 = vmatpush3.bf16.msra.mxu0 %v2150_v49  ;;  %v117_v25 = vsel %vm113_vm1, %v112_v20, %v109_v18  ;;  %v136_v29 = vsel %vm134_vm0, %v131_v59, %v132_v22  ;;  %v135_v32 = vsel %vm134_vm0, %v132_v22, %v133_v24  ;;  %v138_v36 = vsel %vm134_vm0, %v133_v24, %v130_v52  ;;  %v390_v49 = vld [vmem:[%s3407_s6 + $0x20] sm:$0xff]  ;;  %v392_v52 = vld [vmem:[%s3407_s6 + $0x30] sm:$0xff]  ;;  %v397_v59 = vld [vmem:[%s3407_s6 + $0x58] sm:$0xff] }
  0x16   :  { %2153 = vmatprep.subr.bf16.mxu0 %v2152_v53  ;;  %v115_v38 = vsel %vm113_vm1, %v110_v27, %v111_v35  ;;  %v114_v40 = vsel %vm113_vm1, %v111_v35, %v112_v20  ;;  %v2772_v51 = vpack.c.bf16 %v391_v50, %v390_v49  ;;  %v393_v53 = vld [vmem:[%s3407_s6 + $0x38] sm:$0xff]  ;;  %v400_v0 = vld [vmem:[%s3407_s6 + $0x70] sm:$0xff]  ;;  %vm2375_vm13 = vmpackc.low %vm3128_vm9, %vm2461_vm11 }
  0x17   :  { %2183 = vmatpush3.bf16.msra.mxu1 %v2180_v46  ;;  %v389_v46 = vld [vmem:[%s3407_s6 + $0x18] sm:$0xff]  ;;  %v2784_v54 = vpack.c.bf16 %v393_v53, %v392_v52  ;;  %vm3165_vm14 = vmpackc.low %vm2704_vm3, %vm2461_vm11  ;;  %v1400_v37 = vld [vmem:[%s3412_s4 + $0x190] sm:$0xff] }
  0x18   :  { %2185 = vmatprep.subr.bf16.mxu1 %v2184_v60  ;;  %v2760_v47 = vpack.c.bf16 %v389_v46, %v388_v45  ;;  %vm3176_vm15 = vmpackc.low %vm3134_vm10, %vm2461_vm11 }
  0x19   :  { %2155 = vmatpush3.bf16.msra.mxu0 %v2154_v61  ;;  %v398_v61 = vld [vmem:[%s3407_s6 + $0x60] sm:$0xff] }
  0x1a   :  { %2157 = vmatprep.subr.bf16.mxu0 %v2156_v1  ;;  %v2820_v63 = vpack.c.bf16 %v399_v62, %v398_v61  ;;  %v401_v1 = vld [vmem:[%s3407_s6 + $0x78] sm:$0xff] }
  0x1b   :  { %2187 = vmatpush3.bf16.msra.mxu1 %v2184_v60  ;;  %v2808_v60 = vpack.c.bf16 %v397_v59, %v396_v58  ;;  %v2832_v2 = vpack.c.bf16 %v401_v1, %v400_v0  ;;  %v589_v58 = vld [vmem:[%s3409_s5 + $0x8] sm:$0xff]  ;;  %v590_v59 = vld [vmem:[%s3409_s5 + $0x10] sm:$0xff]  ;;  %v591_v62 = vld [vmem:[%s3409_s5 + $0x18] sm:$0xff] }
  0x1c   :  { %2189 = vmatprep.subr.bf16.mxu1 %v2188_v6  ;;  %v584_v0 = vld [vmem:[%s3410_s1] sm:$0xff]  ;;  %v2248_v1 = vpack.c.bf16 %v591_v62, %v590_v59 }
  0x1d   :  { %2159 = vmatpush3.bf16.msra.mxu0 %v2158_v7 }
  0x1e   :  { %2161 = vmatprep.subr.bf16.mxu0 %v2160_v10 }
  0x1f   :  { %2191 = vmatpush3.bf16.msra.mxu1 %v2188_v6  ;;  %v1574_v6 = vld [vmem:[%s3408_s8] ss:$0 sm:$0xff] }
  0x20   :  { %2193 = vmatprep.subr.bf16.mxu1 %v2192_v16 }
  0x21   :  { %2163 = vmatpush3.bf16.msra.mxu0 %v2162_v17 }
  0x22   :  { %2196 = vmatprep.subr.bf16.mxu0 %v2458_v44 }
  0x23   :  { %2195 = vmatpush3.bf16.msra.mxu1 %v2192_v16 }
  0x24   :  { %1576 = vmatmul.mubr.msk.f32.vlgmr.msra.gmra.mrb[0].mxu0 %vm2694_vm2, %v117_v25  ;;  %2220 = vmatprep.subr.bf16.mxu1 %v2458_v44 }
  0x25   :  { %272 = vmatprep.mubr.f32.mxu0 %v2632_v56  ;;  %2198 = vmatpush3.bf16.msra.mxu0 %v2746_v43  ;;  %v395_v56 = vld [vmem:[%s3407_s6 + $0x48] sm:$0xff] }
  0x26   :  { %1935 = vmatmul.mubr.msk.f32.vlgmr.msra.gmra.mrb[0].mxu1 %vm2704_vm3, %v136_v29  ;;  %2199 = vmatprep.subr.bf16.mxu0 %v2458_v44  ;;  %v2796_v57 = vpack.c.bf16 %v395_v56, %v394_v55  ;;  %v588_v56 = vld [vmem:[%s3409_s5] sm:$0xff] }
  0x27   :  { %1937 = vmatprep.mubr.f32.mxu1 %v135_v32  ;;  %2222 = vmatpush3.bf16.msra.mxu1 %v2746_v43  ;;  %v2244_v61 = vpack.c.bf16 %v589_v58, %v588_v56  ;;  %v729_v56 = vld [vmem:[%s3411_s3 + $0x18] sm:$0xff]  ;;  %v760_v58 = vld [vmem:[%s3411_s3 + $0x110] sm:$0xff] }
  0x28   :  { %273 = vmatmul.mubr.f32.gmra.mrb[2].mxu0 %v116_v33  ;;  %2223 = vmatprep.subr.bf16.mxu1 %v2458_v44 }
  0x29   :  { %277 = vmatprep.mubr.f32.mxu0 %v107_v15  ;;  %2201 = vmatpush3.bf16.msra.mxu0 %v2760_v47 }
  0x2a   :  { %1938 = vmatmul.mubr.msk.f32.gmra.mrb[2].mxu1 %vm2724_vm4, %v138_v36  ;;  %2202 = vmatprep.subr.bf16.mxu0 %v2458_v44 }
  0x2b   :  { %2225 = vmatpush3.bf16.msra.mxu1 %v2760_v47  ;;  %2007 = vmatprep.mubr.msk.f32.mxu1 %vm2459_vm6, %v2460_v3 }
  0x2c   :  { %1578 = vmatmul.mubr.msk.f32.gmra.mrb[4].mxu0 %vm2730_vm5, %v115_v38  ;;  %2226 = vmatprep.subr.bf16.mxu1 %v2458_v44 }
  0x2d   :  { %282 = vmatprep.mubr.f32.mxu0 %v108_v13  ;;  %2204 = vmatpush3.bf16.msra.mxu0 %v2772_v51 }
  0x2e   :  { %2205 = vmatprep.subr.bf16.mxu0 %v2458_v44 }
  0x2f   :  { %2228 = vmatpush3.bf16.msra.mxu1 %v2772_v51 }
  0x30   :  { %283 = vmatmul.mubr.f32.gmra.mrb[6].mxu0 %v114_v40  ;;  %2229 = vmatprep.subr.bf16.mxu1 %v2458_v44 }
  0x31   :  { %2207 = vmatpush3.bf16.msra.mxu0 %v2784_v54  ;;  %1972 = vmatprep.mubr.msk.f32.mxu0 %vm2459_vm6, %v2460_v3 }
  0x32   :  { %2208 = vmatprep.subr.bf16.mxu0 %v2458_v44 }
  0x33   :  { %2231 = vmatpush3.bf16.msra.mxu1 %v2784_v54 }
  0x34   :  { %2232 = vmatprep.subr.bf16.mxu1 %v2458_v44 }
  0x35   :  { %2210 = vmatpush3.bf16.msra.mxu0 %v2796_v57 }
  0x36   :  { %2211 = vmatprep.subr.bf16.mxu0 %v2458_v44 }
  0x37   :  { %2234 = vmatpush3.bf16.msra.mxu1 %v2796_v57 }
  0x38   :  { %2235 = vmatprep.subr.bf16.mxu1 %v2458_v44 }
  0x39   :  { %2213 = vmatpush3.bf16.msra.mxu0 %v2808_v60 }
  0x3a   :  { %2214 = vmatprep.subr.bf16.mxu0 %v2458_v44 }
  0x3b   :  { %2237 = vmatpush3.bf16.msra.mxu1 %v2808_v60 }
  0x3c   :  { %2238 = vmatprep.subr.bf16.mxu1 %v2458_v44 }
  0x3d   :  { %2216 = vmatpush3.bf16.msra.mxu0 %v2820_v63 }
  0x3e   :  { %2217 = vmatprep.subr.bf16.mxu0 %v2458_v44 }
  0x3f   :  { %2240 = vmatpush3.bf16.msra.mxu1 %v2820_v63 }
  0x40   :  { %2241 = vmatprep.subr.bf16.mxu1 %v2458_v44 }
  0x41   :  { %2219 = vmatpush3.bf16.msra.mxu0 %v2832_v2 }
  0x42   :  { %2245 = vmatprep.subr.bf16.mxu0 %v2244_v61 }
  0x43   :  { %2243 = vmatpush3.bf16.msra.mxu1 %v2832_v2 }
  0xf7   :  { %v1654_v4 = vpop.f32.mrb[0].mxu0 }
  0xf8   :  { %v1655_v5 = vpop.f32.mrb[1].mxu0 }
  0xf9   :  { %v1656_v7 = vadd.f32 %v1655_v5, %v1654_v4  ;;  %v1936_v8 = vpop.f32.mrb[0].mxu1  ;;  %v742_v4 = vld [vmem:[%s3411_s3 + $0x80] sm:$0xff]  ;;  %v743_v5 = vld [vmem:[%s3411_s3 + $0x88] sm:$0xff] }
  0xfa   :  { %v354_v9 = vpop.f32.mrb[1].mxu1 }
  0xfb   :  { %v1657_v10 = vpop.f32.mrb[2].mxu0  ;;  %v270_v11 = vadd.f32 %v1656_v7, %v1574_v6  ;;  %v758_v7 = vld [vmem:[%s3411_s3 + $0x100] sm:$0xff] }
  0xfc   :  { %v1658_v12 = vpop.f32.mrb[3].mxu0 }
  0xfd   :  { %v1659_v13 = vadd.f32 %v1658_v12, %v1657_v10  ;;  %v2843_v15 = vadd.f32 %v354_v9, %v270_v11  ;;  %v1939_v16 = vpop.f32.mrb[2].mxu1  ;;  %v585_v10 = vld [vmem:[%s3410_s1 + $0x8] sm:$0xff]  ;;  %v586_v11 = vld [vmem:[%s3410_s1 + $0x10] sm:$0xff]  ;;  %v587_v12 = vld [vmem:[%s3410_s1 + $0x18] sm:$0xff] }
  0xfe   :  { %v364_v17 = vpop.f32.mrb[3].mxu1 }
  0xff   :  { %v275_v18 = vadd.f32 %v1659_v13, %v1574_v6  ;;  %v1660_v19 = vpop.f32.mrb[4].mxu0  ;;  %v373_v34 = vmax.f32 %v2843_v15, 0.0  ;;  %v2887_v13 = vsub.s32 0, %v2613_v48  ;;  %v1382_v48 = vld [vmem:[%s3412_s4 + $0x100] sm:$0xff] }
 0x100   :  { %v1661_v20 = vpop.f32.mrb[5].mxu0 }
 0x101   :  { %v360_v22 = vadd.f32 %v1936_v8, %v275_v18  ;;  %v1662_v24 = vadd.f32 %v1661_v20, %v1660_v19  ;;  %v759_v8 = vld [vmem:[%s3411_s3 + $0x108] sm:$0xff] }
 0x102   :  { %v2284_v9 = vpack.c.bf16 %v759_v8, %v758_v7  ;;  %v762_v7 = vld [vmem:[%s3411_s3 + $0x120] sm:$0xff] }
 0x103   :  { %v1663_v25 = vpop.f32.mrb[6].mxu0  ;;  %v280_v27 = vadd.f32 %v1662_v24, %v1574_v6  ;;  %v374_v29 = vmax.f32 %v360_v22, 0.0 }
 0x104   :  { %v1664_v28 = vpop.f32.mrb[7].mxu0 }
 0x105   :  { %v1665_v32 = vadd.f32 %v1664_v28, %v1663_v25  ;;  %v365_v33 = vadd.f32 %v364_v17, %v280_v27  ;;  %v377_v38 = vadd.f32 %v374_v29, %v373_v34 }
 0x107   :  { %v285_v35 = vadd.f32 %v1665_v32, %v1574_v6  ;;  %v375_v36 = vmax.f32 %v365_v33, 0.0  ;;  %v2252_v6 = vpack.c.bf16 %v743_v5, %v742_v4  ;;  %v730_v5 = vld [vmem:[%s3411_s3 + $0x20] sm:$0xff] }
 0x109   :  { %v370_v40 = vadd.f32 %v1939_v16, %v285_v35  ;;  %v378_v42 = vadd.f32 %v377_v38, %v375_v36  ;;  %2253 = vmatprep.subr.bf16.mxu1 %v2252_v6  ;;  %v731_v6 = vld [vmem:[%s3411_s3 + $0x28] sm:$0xff] }
 0x10a   :  { %v2262_v8 = vpack.c.bf16 %v731_v6, %v730_v5  ;;  %v739_v5 = vld [vmem:[%s3411_s3 + $0x68] sm:$0xff] }
 0x10b   :  { %v376_v41 = vmax.f32 %v370_v40, 0.0 }
 0x10d   :  { %v379_v45 = vadd.f32 %v378_v42, %v376_v41  ;;  %v727_v42 = vld [vmem:[%s3411_s3 + $0x8] sm:$0xff] }
 0x10f   :  { %v380_v46 = vrot.slane %v379_v45, 4 }
 0x111   :  { %v381_v49 = vadd.f32 %v380_v46, %v379_v45 }
 0x113   :  { %v382_v50 = vrot.slane %v381_v49, 2 }
 0x115   :  { %v383_v52 = vadd.f32 %v382_v50, %v381_v49  ;;  %v744_v50 = vld [vmem:[%s3411_s3 + $0x90] sm:$0xff] }
 0x117   :  { %v384_v53 = vrot.slane %v383_v52, 1 }
 0x119   :  { %v385_v55 = vadd.f32 %v384_v53, %v383_v52  ;;  %v745_v52 = vld [vmem:[%s3411_s3 + $0x98] sm:$0xff] }
 0x11a   :  { %v2256_v53 = vpack.c.bf16 %v745_v52, %v744_v50  ;;  %v736_v52 = vld [vmem:[%s3411_s3 + $0x50] sm:$0xff] }
 0x11b   :  { %1973 = vmatmul.mubr.f32.vlgmr.msra.gmra.mrb[8].mxu0 %v385_v55  ;;  %v728_v55 = vld [vmem:[%s3411_s3 + $0x10] sm:$0xff] }
 0x11c   :  { %2018 = vmatprep.mubr.msk.f32.mxu0 %vm596_vm7, %v584_v0  ;;  %2247 = vmatpush3.bf16.msra.mxu0 %v2244_v61  ;;  %v2258_v59 = vpack.c.bf16 %v729_v56, %v728_v55  ;;  %v761_v61 = vld [vmem:[%s3411_s3 + $0x118] sm:$0xff]  ;;  %v746_v0 = vld [vmem:[%s3411_s3 + $0xa0] sm:$0xff]  ;;  %v768_v56 = vld [vmem:[%s3411_s3 + $0x150] sm:$0xff] }
 0x11d   :  { %2249 = vmatprep.subr.bf16.mxu0 %v2248_v1  ;;  %v2288_v62 = vpack.c.bf16 %v761_v61, %v760_v58  ;;  %v769_v58 = vld [vmem:[%s3411_s3 + $0x158] sm:$0xff] }
 0x120   :  { %2251 = vmatpush3.bf16.msra.mxu0 %v2248_v1  ;;  %v747_v1 = vld [vmem:[%s3411_s3 + $0xa8] sm:$0xff] }
 0x121   :  { %2285 = vmatprep.subr.bf16.mxu0 %v2284_v9  ;;  %v2260_v4 = vpack.c.bf16 %v747_v1, %v746_v0  ;;  %v755_v1 = vld [vmem:[%s3411_s3 + $0xe8] sm:$0xff] }
 0x123   :  { %2019 = vmatmul.mubr.msk.f32.vlgmr.msra.gmra.mrb[10].mxu0 %vm596_vm7, %v585_v10 }
 0x124   :  { %2021 = vmatprep.mubr.msk.f32.mxu0 %vm596_vm7, %v586_v11  ;;  %2287 = vmatpush3.bf16.msra.mxu0 %v2284_v9  ;;  %v763_v9 = vld [vmem:[%s3411_s3 + $0x128] sm:$0xff]  ;;  %v748_v11 = vld [vmem:[%s3411_s3 + $0xb0] sm:$0xff] }
 0x125   :  { %2289 = vmatprep.subr.bf16.mxu0 %v2288_v62  ;;  %v2292_v10 = vpack.c.bf16 %v763_v9, %v762_v7  ;;  %v771_v9 = vld [vmem:[%s3411_s3 + $0x168] sm:$0xff] }
 0x127   :  { %2022 = vmatmul.mubr.msk.f32.gmra.mrb[12].mxu0 %vm596_vm7, %v587_v12  ;;  %v749_v12 = vld [vmem:[%s3411_s3 + $0xb8] sm:$0xff] }
 0x128   :  { %2291 = vmatpush3.bf16.msra.mxu0 %v2288_v62  ;;  %v754_v62 = vld [vmem:[%s3411_s3 + $0xe0] sm:$0xff] }
 0x129   :  { %2293 = vmatprep.subr.bf16.mxu0 %v2292_v10  ;;  %v2276_v6 = vpack.c.bf16 %v755_v1, %v754_v62 }
 0x12c   :  { %2295 = vmatpush3.bf16.msra.mxu0 %v2292_v10 }
 0x1ee   :  { %v468_v15 = vpop.f32.mrb[8].mxu0 }
 0x1ef   :  { %v472_v16 = vmul.f32 0.001953125, %v468_v15  ;;  %v1974_v17 = vpop.f32.mrb[9].mxu0  ;;  %v2264_v15 = vpack.c.bf16 %v749_v12, %v748_v11  ;;  %v756_v11 = vld [vmem:[%s3411_s3 + $0xf0] sm:$0xff]  ;;  %v757_v12 = vld [vmem:[%s3411_s3 + $0xf8] sm:$0xff] }
 0x1f0   :  { %v733_v17 = vld [vmem:[%s3411_s3 + $0x38] sm:$0xff] }
 0x1f1   :  { %v476_v18 = vrot.slane %v472_v16, %v2887_v13  ;;  %v732_v16 = vld [vmem:[%s3411_s3 + $0x30] sm:$0xff] }
 0x1f3   :  { %v2890_v19 = vsub.f32 %v373_v34, %v476_v18  ;;  %v2892_v20 = vsub.f32 %v374_v29, %v476_v18  ;;  %v2894_v22 = vsub.f32 %v375_v36, %v476_v18  ;;  %v2896_v24 = vsub.f32 %v376_v41, %v476_v18  ;;  %v726_v41 = vld [vmem:[%s3411_s3] sm:$0xff]  ;;  %v764_v18 = vld [vmem:[%s3411_s3 + $0x130] sm:$0xff] }
 0x1f4   :  { %v2254_v46 = vpack.c.bf16 %v727_v42, %v726_v41 }
 0x1f5   :  { %v481_v25 = vmul.f32 %v2890_v19, %v2890_v19  ;;  %v482_v27 = vmul.f32 %v2892_v20, %v2892_v20  ;;  %v483_v28 = vmul.f32 %v2894_v22, %v2894_v22  ;;  %v484_v33 = vmul.f32 %v2896_v24, %v2896_v24 }
 0x1f6   :  { %v2020_v42 = vpop.f32.mrb[10].mxu0 }
 0x1f7   :  { %v485_v32 = vadd.f32 %v482_v27, %v481_v25  ;;  %v2266_v25 = vpack.c.bf16 %v733_v17, %v732_v16  ;;  %v765_v27 = vld [vmem:[%s3411_s3 + $0x138] sm:$0xff]  ;;  %v740_v16 = vld [vmem:[%s3411_s3 + $0x70] sm:$0xff] }
 0x1f8   :  { %v741_v17 = vld [vmem:[%s3411_s3 + $0x78] sm:$0xff] }
 0x1f9   :  { %v486_v34 = vadd.f32 %v485_v32, %v483_v28  ;;  %v2296_v28 = vpack.c.bf16 %v765_v27, %v764_v18  ;;  %v750_v32 = vld [vmem:[%s3411_s3 + $0xc0] sm:$0xff]  ;;  %v772_v18 = vld [vmem:[%s3411_s3 + $0x170] sm:$0xff]  ;;  %v773_v27 = vld [vmem:[%s3411_s3 + $0x178] sm:$0xff] }
 0x1fb   :  { %v487_v29 = vadd.f32 %v486_v34, %v484_v33  ;;  %v751_v33 = vld [vmem:[%s3411_s3 + $0xc8] sm:$0xff]  ;;  %2297 = vmatprep.subr.bf16.mxu0 %v2296_v28 }
 0x1fc   :  { %v2268_v34 = vpack.c.bf16 %v751_v33, %v750_v32  ;;  %2299 = vmatpush3.bf16.msra.mxu0 %v2296_v28  ;;  %v2312_v28 = vpack.c.bf16 %v773_v27, %v772_v18 }
 0x1fd   :  { %v488_v35 = vrot.slane %v487_v29, 4 }
 0x1ff   :  { %v489_v36 = vadd.f32 %v488_v35, %v487_v29  ;;  %v734_v29 = vld [vmem:[%s3411_s3 + $0x40] sm:$0xff]  ;;  %v735_v35 = vld [vmem:[%s3411_s3 + $0x48] sm:$0xff] }
 0x201   :  { %v490_v38 = vrot.slane %v489_v36, 2 }
 0x203   :  { %v491_v40 = vadd.f32 %v490_v38, %v489_v36  ;;  %v766_v36 = vld [vmem:[%s3411_s3 + $0x140] sm:$0xff]  ;;  %v2270_v38 = vpack.c.bf16 %v735_v35, %v734_v29 }
 0x204   :  { %v98_v35 = vld [vmem:[%s3408_s8 + $0x1] sm:$0x1] }
 0x205   :  { %v492_v45 = vrot.slane %v491_v40, 1 }
 0x207   :  { %v493_v49 = vadd.f32 %v492_v45, %v491_v40  ;;  %v767_v40 = vld [vmem:[%s3411_s3 + $0x148] sm:$0xff]  ;;  %v752_v45 = vld [vmem:[%s3411_s3 + $0xd0] sm:$0xff] }
 0x208   :  { %v2300_v41 = vpack.c.bf16 %v767_v40, %v766_v36  ;;  %v1584_v36 = vld [vmem:[%s3408_s8 + $0x3] ss:$0 sm:$0xff] }
 0x209   :  { %2008 = vmatmul.mubr.f32.vlgmr.msra.gmra.mrb[4].mxu1 %v493_v49  ;;  %v675_v49 = vpop.f32.mrb[11].mxu0 }
 0x20a   :  { %2255 = vmatpush3.bf16.msra.mxu1 %v2254_v46  ;;  %v753_v46 = vld [vmem:[%s3411_s3 + $0xd8] sm:$0xff]  ;;  %2301 = vmatprep.subr.bf16.mxu0 %v2300_v41  ;;  %v2023_v61 = vpop.f32.mrb[12].mxu0 }
 0x20b   :  { %2257 = vmatprep.subr.bf16.mxu1 %v2256_v53  ;;  %v2272_v50 = vpack.c.bf16 %v753_v46, %v752_v45  ;;  %v737_v53 = vld [vmem:[%s3411_s3 + $0x58] sm:$0xff]  ;;  %2303 = vmatpush3.bf16.msra.mxu0 %v2300_v41  ;;  %v685_v0 = vpop.f32.mrb[13].mxu0  ;;  %v691_v40 = vadd.f32 %v2023_v61, %v1584_v36  ;;  %v681_v46 = vadd.f32 %v2020_v42, %v1584_v36 }
 0x20c   :  { %v2274_v55 = vpack.c.bf16 %v737_v53, %v736_v52  ;;  %v686_v41 = vadd.f32 %v1584_v36, %v685_v0  ;;  %v1583_v53 = vld [vmem:[%s3408_s8 + $0x2] ss:$0 sm:$0xff] }
 0x20d   :  { %v695_v0 = vmax.f32 %v681_v46, 0.0 }
 0x20e   :  { %2259 = vmatpush3.bf16.msra.mxu1 %v2258_v59  ;;  %v2304_v59 = vpack.c.bf16 %v769_v58, %v768_v56  ;;  %v696_v56 = vmax.f32 %v686_v41, 0.0 }
 0x20f   :  { %2261 = vmatprep.subr.bf16.mxu1 %v2260_v4  ;;  %v738_v4 = vld [vmem:[%s3411_s3 + $0x60] sm:$0xff] }
 0x210   :  { %2305 = vmatprep.subr.bf16.mxu0 %v2304_v59  ;;  %v2278_v7 = vpack.c.bf16 %v739_v5, %v738_v4 }
 0x211   :  { %2307 = vmatpush3.bf16.msra.mxu0 %v2304_v59 }
 0x212   :  { %2263 = vmatpush3.bf16.msra.mxu1 %v2262_v8  ;;  %v770_v8 = vld [vmem:[%s3411_s3 + $0x160] sm:$0xff] }
 0x213   :  { %2265 = vmatprep.subr.bf16.mxu1 %v2264_v15  ;;  %v2308_v10 = vpack.c.bf16 %v771_v9, %v770_v8  ;;  %v2280_v15 = vpack.c.bf16 %v757_v12, %v756_v11 }
 0x215   :  { %2309 = vmatprep.subr.bf16.mxu0 %v2308_v10 }
 0x216   :  { %2267 = vmatpush3.bf16.msra.mxu1 %v2266_v25  ;;  %2311 = vmatpush3.bf16.msra.mxu0 %v2308_v10  ;;  %v2282_v25 = vpack.c.bf16 %v741_v17, %v740_v16 }
 0x217   :  { %2269 = vmatprep.subr.bf16.mxu1 %v2268_v34  ;;  %2313 = vmatprep.subr.bf16.mxu0 %v2312_v28 }
 0x21a   :  { %2271 = vmatpush3.bf16.msra.mxu1 %v2270_v38  ;;  %2315 = vmatpush3.bf16.msra.mxu0 %v2312_v28 }
 0x21b   :  { %2273 = vmatprep.subr.bf16.mxu1 %v2272_v50  ;;  %2340 = vmatprep.subr.bf16.mxu0 %v2458_v44  ;;  %v676_v50 = vadd.f32 %v1584_v36, %v675_v49 }
 0x21d   :  { %v694_v1 = vmax.f32 %v676_v50, 0.0 }
 0x21e   :  { %2275 = vmatpush3.bf16.msra.mxu1 %v2274_v55  ;;  %v697_v55 = vmax.f32 %v691_v40, 0.0 }
 0x21f   :  { %2277 = vmatprep.subr.bf16.mxu1 %v2276_v6 }
 0x222   :  { %2279 = vmatpush3.bf16.msra.mxu1 %v2278_v7 }
 0x223   :  { %2281 = vmatprep.subr.bf16.mxu1 %v2280_v15 }
 0x226   :  { %2283 = vmatpush3.bf16.msra.mxu1 %v2282_v25 }
 0x227   :  { %2316 = vmatprep.subr.bf16.mxu1 %v2458_v44 }
 0x2dc   :  { %v560_v32 = vpop.f32.mrb[4].mxu1 }
 0x2dd   :  { %v564_v33 = vmul.f32 0.001953125, %v560_v32  ;;  %v2009_v34 = vpop.f32.mrb[5].mxu1 }
 0x2df   :  { %v565_v29 = vadd.f32 1e-05, %v564_v33 }
 0x2e1   :  { %2454 = vrsqrt.f32 %v565_v29 }
 0x2eb   :  { %v2455_v38 = vpop.eup %2454 }
 0x2ec   :  { %v567_v45 = vmul.f32 %v2455_v38, %v98_v35 }
 0x2ee   :  { %v571_v52 = vrot.slane %v567_v45, %v2887_v13 }
 0x2f0   :  { %v573_v58 = vmul.f32 %v571_v52, %v2892_v20  ;;  %v572_v59 = vmul.f32 %v571_v52, %v2890_v19  ;;  %v575_v62 = vmul.f32 %v571_v52, %v2896_v24  ;;  %v574_v61 = vmul.f32 %v571_v52, %v2894_v22 }
 0x2f2   :  { %v581_v42 = vadd.f32 %v1583_v53, %v573_v58  ;;  %v580_v49 = vadd.f32 %v1583_v53, %v572_v59  ;;  %v583_v4 = vadd.f32 %v1583_v53, %v575_v62  ;;  %v582_v5 = vadd.f32 %v1583_v53, %v574_v61 }
 0x2f4   :  { %v699_v6 = vadd.f32 %v695_v0, %v581_v42  ;;  %v698_v7 = vadd.f32 %v694_v1, %v580_v49  ;;  %v701_v8 = vadd.f32 %v697_v55, %v583_v4  ;;  %v700_v9 = vadd.f32 %v696_v56, %v582_v5 }
 0x2f6   :  { %v702_v10 = vrot.slane %v698_v7, 7  ;;  %v705_v11 = vrot.slane %v701_v8, 7  ;;  %v704_v12 = vrot.slane %v700_v9, 7  ;;  %v716_v20 = vrot.slane %v700_v9, 1  ;;  %842 = vmatprep.mubr.f32.mxu1 %v698_v7 }
 0x2f7   :  { %v714_v19 = vrot.slane %v698_v7, 1  ;;  %v715_v15 = vrot.slane %v699_v6, 1  ;;  %v717_v24 = vrot.slane %v701_v8, 1  ;;  %v703_v16 = vrot.slane %v699_v6, 7 }
 0x2f8   :  { %v709_v22 = vsel %vm113_vm1, %v705_v11, %v702_v10  ;;  %v706_v17 = vsel %vm113_vm1, %v704_v12, %v705_v11 }
 0x2f9   :  { %1591 = vmatmul.mubr.msk.f32.vlgmr.msra.gmra.mrb[6].mxu1 %vm2694_vm2, %v709_v22  ;;  %v720_v18 = vsel %vm134_vm0, %v714_v19, %v715_v15  ;;  %v719_v25 = vsel %vm134_vm0, %v715_v15, %v716_v20  ;;  %v718_v27 = vsel %vm134_vm0, %v716_v20, %v717_v24  ;;  %v708_v28 = vsel %vm113_vm1, %v702_v10, %v703_v16  ;;  %vm2372_vm2 = vmpackc.low %vm2461_vm11, %vm2730_vm5 }
 0x2fa   :  { %2056 = vmatprep.mubr.f32.mxu0 %v720_v18  ;;  %847 = vmatprep.mubr.f32.mxu1 %v699_v6  ;;  %v721_v32 = vsel %vm134_vm0, %v717_v24, %v714_v19  ;;  %v707_v33 = vsel %vm113_vm1, %v703_v16, %v704_v12 }
 0x2fb   :  { %2057 = vmatmul.mubr.msk.f32.vlgmr.msra.gmra.mrb[14].mxu0 %vm2704_vm3, %v719_v25  ;;  %2318 = vmatpush3.bf16.msra.mxu1 %v2746_v43 }
 0x2fc   :  { %2059 = vmatprep.mubr.f32.mxu0 %v718_v27  ;;  %2319 = vmatprep.subr.bf16.mxu1 %v2458_v44 }
 0x2fd   :  { %848 = vmatmul.mubr.f32.gmra.mrb[8].mxu1 %v708_v28  ;;  %2342 = vmatpush3.bf16.msra.mxu0 %v2746_v43 }
 0x2fe   :  { %852 = vmatprep.mubr.f32.mxu1 %v700_v9  ;;  %2343 = vmatprep.subr.bf16.mxu0 %v2458_v44 }
 0x2ff   :  { %2060 = vmatmul.mubr.msk.f32.gmra.mrb[16].mxu0 %vm2724_vm4, %v721_v32  ;;  %2321 = vmatpush3.bf16.msra.mxu1 %v2760_v47 }
 0x300   :  { %2322 = vmatprep.subr.bf16.mxu1 %v2458_v44  ;;  %2129 = vmatprep.mubr.msk.f32.mxu0 %vm2459_vm6, %v2460_v3 }
 0x301   :  { %1593 = vmatmul.mubr.msk.f32.gmra.mrb[10].mxu1 %vm2730_vm5, %v707_v33  ;;  %2345 = vmatpush3.bf16.msra.mxu0 %v2760_v47 }
 0x302   :  { %857 = vmatprep.mubr.f32.mxu1 %v701_v8  ;;  %2346 = vmatprep.subr.bf16.mxu0 %v2458_v44 }
 0x303   :  { %2324 = vmatpush3.bf16.msra.mxu1 %v2772_v51 }
 0x304   :  { %2325 = vmatprep.subr.bf16.mxu1 %v2458_v44 }
 0x305   :  { %858 = vmatmul.mubr.f32.gmra.mrb[12].mxu1 %v706_v17  ;;  %2348 = vmatpush3.bf16.msra.mxu0 %v2772_v51  ;;  %v1589_v51 = vld [vmem:[%s3408_s8 + $0x4] ss:$0 sm:$0xff] }
 0x306   :  { %2094 = vmatprep.mubr.msk.f32.mxu1 %vm2459_vm6, %v2460_v3  ;;  %2349 = vmatprep.subr.bf16.mxu0 %v2458_v44 }
 0x307   :  { %2327 = vmatpush3.bf16.msra.mxu1 %v2784_v54 }
 0x308   :  { %2328 = vmatprep.subr.bf16.mxu1 %v2458_v44 }
 0x309   :  { %2351 = vmatpush3.bf16.msra.mxu0 %v2784_v54 }
 0x30a   :  { %2352 = vmatprep.subr.bf16.mxu0 %v2458_v44 }
 0x30b   :  { %2330 = vmatpush3.bf16.msra.mxu1 %v2796_v57 }
 0x30c   :  { %2331 = vmatprep.subr.bf16.mxu1 %v2458_v44 }
 0x30d   :  { %2354 = vmatpush3.bf16.msra.mxu0 %v2796_v57 }
 0x30e   :  { %2355 = vmatprep.subr.bf16.mxu0 %v2458_v44 }
 0x30f   :  { %2333 = vmatpush3.bf16.msra.mxu1 %v2808_v60 }
 0x310   :  { %2334 = vmatprep.subr.bf16.mxu1 %v2458_v44 }
 0x311   :  { %2357 = vmatpush3.bf16.msra.mxu0 %v2808_v60 }
 0x312   :  { %2358 = vmatprep.subr.bf16.mxu0 %v2458_v44 }
 0x313   :  { %2336 = vmatpush3.bf16.msra.mxu1 %v2820_v63 }
 0x314   :  { %2337 = vmatprep.subr.bf16.mxu1 %v2458_v44 }
 0x315   :  { %2360 = vmatpush3.bf16.msra.mxu0 %v2820_v63 }
 0x316   :  { %2361 = vmatprep.subr.bf16.mxu0 %v2458_v44 }
 0x317   :  { %2339 = vmatpush3.bf16.msra.mxu1 %v2832_v2 }
 0x319   :  { %2363 = vmatpush3.bf16.msra.mxu0 %v2832_v2 }
 0x3cc   :  { %v1760_v43 = vpop.f32.mrb[6].mxu1 }
 0x3cd   :  { %v1761_v47 = vpop.f32.mrb[7].mxu1 }
 0x3ce   :  { %v1762_v54 = vadd.f32 %v1761_v47, %v1760_v43  ;;  %v2058_v57 = vpop.f32.mrb[14].mxu0 }
 0x3cf   :  { %v929_v60 = vpop.f32.mrb[15].mxu0 }
 0x3d0   :  { %v845_v34 = vadd.f32 %v1762_v54, %v1589_v51  ;;  %v1763_v29 = vpop.f32.mrb[8].mxu1 }
 0x3d1   :  { %v1764_v35 = vpop.f32.mrb[9].mxu1 }
 0x3d2   :  { %v930_v36 = vadd.f32 %v929_v60, %v845_v34  ;;  %v1765_v63 = vadd.f32 %v1764_v35, %v1763_v29  ;;  %v2061_v38 = vpop.f32.mrb[16].mxu0 }
 0x3d3   :  { %v939_v44 = vpop.f32.mrb[17].mxu0 }
 0x3d4   :  { %v850_v40 = vadd.f32 %v1765_v63, %v1589_v51  ;;  %v1766_v41 = vpop.f32.mrb[10].mxu1  ;;  %v948_v59 = vmax.f32 %v930_v36, 0.0  ;;  %v102_v63 = vld [vmem:[%s3408_s8 + $0x5] sm:$0x1] }
 0x3d5   :  { %v1767_v45 = vpop.f32.mrb[11].mxu1 }
 0x3d6   :  { %v935_v2 = vadd.f32 %v2058_v57, %v850_v40  ;;  %v1768_v46 = vadd.f32 %v1767_v45, %v1766_v41  ;;  %v1598_v41 = vld [vmem:[%s3408_s8 + $0x6] ss:$0 sm:$0xff] }
 0x3d8   :  { %v855_v50 = vadd.f32 %v1768_v46, %v1589_v51  ;;  %v1769_v52 = vpop.f32.mrb[12].mxu1  ;;  %v949_v55 = vmax.f32 %v935_v2, 0.0 }
 0x3d9   :  { %v1770_v53 = vpop.f32.mrb[13].mxu1 }
 0x3da   :  { %v940_v56 = vadd.f32 %v939_v44, %v855_v50  ;;  %v1771_v58 = vadd.f32 %v1770_v53, %v1769_v52  ;;  %v952_v0 = vadd.f32 %v949_v55, %v948_v59 }
 0x3dc   :  { %v950_v62 = vmax.f32 %v940_v56, 0.0  ;;  %v860_v61 = vadd.f32 %v1771_v58, %v1589_v51  ;;  %v1402_v58 = vld [vmem:[%s3412_s4 + $0x1a0] sm:$0xff] }
 0x3de   :  { %v945_v1 = vadd.f32 %v2061_v38, %v860_v61  ;;  %v953_v42 = vadd.f32 %v952_v0, %v950_v62 }
 0x3e0   :  { %v951_v49 = vmax.f32 %v945_v1, 0.0 }
 0x3e2   :  { %v954_v4 = vadd.f32 %v953_v42, %v951_v49 }
 0x3e4   :  { %v955_v5 = vrot.slane %v954_v4, 4 }
 0x3e6   :  { %v956_v6 = vadd.f32 %v955_v5, %v954_v4  ;;  %v1366_v5 = vld [vmem:[%s3412_s4 + $0x80] sm:$0xff] }
 0x3e8   :  { %v957_v7 = vrot.slane %v956_v6, 2 }
 0x3ea   :  { %v958_v8 = vadd.f32 %v957_v7, %v956_v6  ;;  %v1367_v6 = vld [vmem:[%s3412_s4 + $0x88] sm:$0xff] }
 0x3ec   :  { %v959_v9 = vrot.slane %v958_v8, 1 }
 0x3ee   :  { %v960_v10 = vadd.f32 %v959_v9, %v958_v8 }
 0x3f0   :  { %2095 = vmatmul.mubr.f32.vlgmr.msra.gmra.mrb[14].mxu1 %v960_v10 }
 0x3f1   :  { %1260 = vmatprep.mubr.f32.mxu1 %v2460_v3 }
 0x4c3   :  { %v1027_v11 = vpop.f32.mrb[14].mxu1 }
 0x4c4   :  { %v1031_v12 = vmul.f32 0.001953125, %v1027_v11  ;;  %v2096_v20 = vpop.f32.mrb[15].mxu1 }
 0x4c6   :  { %v1035_v19 = vrot.slane %v1031_v12, %v2887_v13 }
 0x4c8   :  { %v1036_v15 = vsub.f32 %v948_v59, %v1035_v19  ;;  %v1037_v24 = vsub.f32 %v949_v55, %v1035_v19  ;;  %v1038_v16 = vsub.f32 %v950_v62, %v1035_v19  ;;  %v1039_v22 = vsub.f32 %v951_v49, %v1035_v19 }
 0x4ca   :  { %v1040_v17 = vmul.f32 %v1036_v15, %v1036_v15  ;;  %v1041_v18 = vmul.f32 %v1037_v24, %v1037_v24  ;;  %v1042_v25 = vmul.f32 %v1038_v16, %v1038_v16  ;;  %v1043_v28 = vmul.f32 %v1039_v22, %v1039_v22 }
 0x4cc   :  { %v1044_v27 = vadd.f32 %v1041_v18, %v1040_v17 }
 0x4ce   :  { %v1045_v32 = vadd.f32 %v1044_v27, %v1042_v25  ;;  %v1398_v25 = vld [vmem:[%s3412_s4 + $0x180] sm:$0xff]  ;;  %v1399_v27 = vld [vmem:[%s3412_s4 + $0x188] sm:$0xff] }
 0x4d0   :  { %v1046_v33 = vadd.f32 %v1045_v32, %v1043_v28 }
 0x4d2   :  { %v1047_v43 = vrot.slane %v1046_v33, 4 }
 0x4d4   :  { %v1048_v47 = vadd.f32 %v1047_v43, %v1046_v33 }
 0x4d6   :  { %v1049_v51 = vrot.slane %v1048_v47, 2 }
 0x4d8   :  { %v1050_v54 = vadd.f32 %v1049_v51, %v1048_v47  ;;  %v1350_v47 = vld [vmem:[%s3412_s4] sm:$0xff]  ;;  %v1351_v51 = vld [vmem:[%s3412_s4 + $0x8] sm:$0xff] }
 0x4da   :  { %v1051_v57 = vrot.slane %v1050_v54, 1 }
 0x4dc   :  { %v1052_v60 = vadd.f32 %v1051_v57, %v1050_v54  ;;  %v1368_v57 = vld [vmem:[%s3412_s4 + $0x90] sm:$0xff] }
 0x4de   :  { %2130 = vmatmul.mubr.f32.vlgmr.msra.gmra.mrb[18].mxu0 %v1052_v60  ;;  %v1369_v60 = vld [vmem:[%s3412_s4 + $0x98] sm:$0xff] }
 0x4df   :  { %1337 = vmatprep.mubr.f32.mxu0 %v2460_v3 }
 0x5b1   :  { %v1119_v34 = vpop.f32.mrb[18].mxu0 }
 0x5b2   :  { %v1123_v29 = vmul.f32 0.001953125, %v1119_v34  ;;  %v2131_v35 = vpop.f32.mrb[19].mxu0  ;;  %v2418_v34 = vpack.c.bf16 %v1399_v27, %v1398_v25  ;;  %v1390_v25 = vld [vmem:[%s3412_s4 + $0x140] sm:$0xff]  ;;  %v1391_v27 = vld [vmem:[%s3412_s4 + $0x148] sm:$0xff] }
 0x5b4   :  { %v1124_v36 = vadd.f32 1e-05, %v1123_v29  ;;  %v1383_v29 = vld [vmem:[%s3412_s4 + $0x108] sm:$0xff] }
 0x5b6   :  { %2456 = vrsqrt.f32 %v1124_v36  ;;  %v1188_v36 = vld [vmem:[%s3413_s7] sm:$0xff] }
 0x5c0   :  { %v2457_v38 = vpop.eup %2456 }
 0x5c1   :  { %v1126_v44 = vmul.f32 %v2457_v38, %v102_v63  ;;  %v2388_v63 = vpack.c.bf16 %v1351_v51, %v1350_v47  ;;  %v1401_v38 = vld [vmem:[%s3412_s4 + $0x198] sm:$0xff]  ;;  %v1360_v47 = vld [vmem:[%s3412_s4 + $0x50] sm:$0xff] }
 0x5c2   :  { %v1361_v51 = vld [vmem:[%s3412_s4 + $0x58] sm:$0xff] }
 0x5c3   :  { %v1130_v40 = vrot.slane %v1126_v44, %v2887_v13  ;;  %v2390_v44 = vpack.c.bf16 %v1369_v60, %v1368_v57  ;;  %v1403_v13 = vld [vmem:[%s3412_s4 + $0x1a8] sm:$0xff] }
 0x5c4   :  { %v1379_v57 = vld [vmem:[%s3412_s4 + $0xe8] sm:$0xff] }
 0x5c5   :  { %v1131_v45 = vmul.f32 %v1130_v40, %v1036_v15  ;;  %v1132_v2 = vmul.f32 %v1130_v40, %v1037_v24  ;;  %v1133_v46 = vmul.f32 %v1130_v40, %v1038_v16  ;;  %v1134_v50 = vmul.f32 %v1130_v40, %v1039_v22  ;;  %v1352_v40 = vld [vmem:[%s3412_s4 + $0x10] sm:$0xff] }
 0x5c6   :  { %v2386_v16 = vpack.c.bf16 %v1367_v6, %v1366_v5  ;;  %v1356_v5 = vld [vmem:[%s3412_s4 + $0x30] sm:$0xff]  ;;  %v1357_v6 = vld [vmem:[%s3412_s4 + $0x38] sm:$0xff] }
 0x5c7   :  { %v1139_v52 = vadd.f32 %v1598_v41, %v1131_v45  ;;  %v1140_v53 = vadd.f32 %v1598_v41, %v1132_v2  ;;  %v1141_v55 = vadd.f32 %v1598_v41, %v1133_v46  ;;  %v1142_v56 = vadd.f32 %v1598_v41, %v1134_v50  ;;  %v1353_v41 = vld [vmem:[%s3412_s4 + $0x18] sm:$0xff]  ;;  %v1370_v2 = vld [vmem:[%s3412_s4 + $0xa0] sm:$0xff]  ;;  %v1371_v46 = vld [vmem:[%s3412_s4 + $0xa8] sm:$0xff] }
 0x5c8   :  { %v2420_v45 = vpack.c.bf16 %v1383_v29, %v1382_v48  ;;  %v2422_v50 = vpack.c.bf16 %v1401_v38, %v1400_v37  ;;  %v1393_v48 = vld [vmem:[%s3412_s4 + $0x158] sm:$0xff]  ;;  %v2408_v29 = vpack.c.bf16 %v1361_v51, %v1360_v47  ;;  %v1362_v37 = vld [vmem:[%s3412_s4 + $0x60] sm:$0xff]  ;;  %v1363_v38 = vld [vmem:[%s3412_s4 + $0x68] sm:$0xff] }
 0x5c9   :  { %v2364_v59 = vpack.c.bf16 %v1140_v53, %v1139_v52  ;;  %v1143_v62 = vrot.slane %v1139_v52, 7  ;;  %v1144_v61 = vrot.slane %v1140_v53, 7  ;;  %v1146_v0 = vrot.slane %v1142_v56, 7 }
 0x5ca   :  { %v1167_v1 = vrot.slane %v1139_v52, 2  ;;  %v1168_v42 = vrot.slane %v1140_v53, 2  ;;  %v1169_v49 = vrot.slane %v1141_v55, 2  ;;  %v2369_v4 = vpack.c.bf16 %v1142_v56, %v1141_v55 }
 0x5cb   :  { %2365 = vmatprep.subr.bf16.mxu1 %v2364_v59  ;;  %v1149_v14 = vsel %vm113_vm1, %v1143_v62, %v1144_v61  ;;  %v1150_v21 = vsel %vm113_vm1, %v1146_v0, %v1143_v62  ;;  %v1155_v23 = vrot.slane %v1139_v52, 1  ;;  %v1156_v31 = vrot.slane %v1140_v53, 1  ;;  %v1384_v52 = vld [vmem:[%s3412_s4 + $0x110] sm:$0xff]  ;;  %v1385_v53 = vld [vmem:[%s3412_s4 + $0x118] sm:$0xff]  ;;  %v1354_v62 = vld [vmem:[%s3412_s4 + $0x20] sm:$0xff] }
 0x5cc   :  { %v2366_v7 = vpack.c.bf16 %v1149_v14, %v1150_v21  ;;  %v1173_v8 = vsel %vm1171_vm8, %v1168_v42, %v1169_v49  ;;  %v1174_v9 = vsel %vm1171_vm8, %v1167_v1, %v1168_v42  ;;  %v1157_v26 = vrot.slane %v1141_v55, 1  ;;  %v1373_v42 = vld [vmem:[%s3412_s4 + $0xb8] sm:$0xff]  ;;  %v1404_v21 = vld [vmem:[%s3412_s4 + $0x1b0] sm:$0xff] }
 0x5cd   :  { %v2374_v10 = vpack.c.bf16 %v1173_v8, %v1174_v9  ;;  %v1161_v11 = vsel %vm134_vm0, %v1155_v23, %v1156_v31  ;;  %v1170_v12 = vrot.slane %v1142_v56, 2  ;;  %v1145_v20 = vrot.slane %v1141_v55, 7  ;;  %v1189_v55 = vld [vmem:[%s3413_s7 + $0x8] sm:$0xff]  ;;  %v1374_v8 = vld [vmem:[%s3412_s4 + $0xc0] sm:$0xff] }
 0x5ce   :  { %2368 = vmatpush1.bf16.msk.msra.mxu1 %vm2367_vm12, %v2366_v7  ;;  %v1160_v19 = vsel %vm134_vm0, %v1156_v31, %v1157_v26  ;;  %v1158_v24 = vrot.slane %v1142_v56, 1  ;;  %v2392_v56 = vpack.c.bf16 %v1353_v41, %v1352_v40  ;;  %v2394_v59 = vpack.c.bf16 %v1371_v46, %v1370_v2  ;;  %v1375_v9 = vld [vmem:[%s3412_s4 + $0xc8] sm:$0xff]  ;;  %v1380_v40 = vld [vmem:[%s3412_s4 + $0xf0] sm:$0xff]  ;;  %v1381_v41 = vld [vmem:[%s3412_s4 + $0xf8] sm:$0xff] }
 0x5cf   :  { %2376 = vmatprep.subr.msk.bf16.mxu0 %vm2375_vm13, %v2374_v10  ;;  %2370 = vmatprep.subr.bf16.mxu1 %v2369_v4  ;;  %v2377_v22 = vpack.c.bf16 %v1160_v19, %v1161_v11  ;;  %v1172_v17 = vsel %vm1171_vm8, %v1169_v49, %v1170_v12  ;;  %v1175_v18 = vsel %vm1171_vm8, %v1170_v12, %v1167_v1  ;;  %v1372_v1 = vld [vmem:[%s3412_s4 + $0xb0] sm:$0xff]  ;;  %v1386_v4 = vld [vmem:[%s3412_s4 + $0x120] sm:$0xff]  ;;  %v1389_v11 = vld [vmem:[%s3412_s4 + $0x138] sm:$0xff] }
 0x5d0   :  { %v2380_v28 = vpack.c.bf16 %v1175_v18, %v1172_v17  ;;  %v1147_v32 = vsel %vm113_vm1, %v1145_v20, %v1146_v0  ;;  %v1148_v33 = vsel %vm113_vm1, %v1144_v61, %v1145_v20  ;;  %v1159_v43 = vsel %vm134_vm0, %v1157_v26, %v1158_v24  ;;  %vm2384_vm1 = vmpackc.low %vm2724_vm4, %vm2461_vm11  ;;  %v1355_v61 = vld [vmem:[%s3412_s4 + $0x28] sm:$0xff]  ;;  %v1388_v10 = vld [vmem:[%s3412_s4 + $0x130] sm:$0xff] }
 0x5d1   :  { %2379 = vmatpush1.bf16.msk.msra.mxu0 %vm3165_vm14, %v2377_v22  ;;  %v2371_v54 = vpack.c.bf16 %v1147_v32, %v1148_v33  ;;  %v1162_v39 = vsel %vm134_vm0, %v1158_v24, %v1155_v23  ;;  %v2424_v0 = vpack.c.bf16 %v1385_v53, %v1384_v52  ;;  %v2426_v49 = vpack.c.bf16 %v1403_v13, %v1402_v58  ;;  %v1405_v23 = vld [vmem:[%s3412_s4 + $0x1b8] sm:$0xff]  ;;  %v1406_v20 = vld [vmem:[%s3412_s4 + $0x1c0] sm:$0xff]  ;;  %v1407_v19 = vld [vmem:[%s3412_s4 + $0x1c8] sm:$0xff] }
 0x5d2   :  { %2382 = vmatprep.subr.msk.bf16.mxu0 %vm3176_vm15, %v2380_v28  ;;  %v2383_v35 = vpack.c.bf16 %v1162_v39, %v1159_v43  ;;  %v2396_v14 = vpack.c.bf16 %v1355_v61, %v1354_v62  ;;  %v2398_v31 = vpack.c.bf16 %v1373_v42, %v1372_v1  ;;  %v2430_v26 = vpack.c.bf16 %v1405_v23, %v1404_v21  ;;  %v1358_v24 = vld [vmem:[%s3412_s4 + $0x40] sm:$0xff]  ;;  %v1376_v17 = vld [vmem:[%s3412_s4 + $0xd0] sm:$0xff]  ;;  %v1377_v18 = vld [vmem:[%s3412_s4 + $0xd8] sm:$0xff] }
 0x5d3   :  { %2373 = vmatpush1.bf16.msk.msra.mxu1 %vm2372_vm2, %v2371_v54  ;;  %v2400_v12 = vpack.c.bf16 %v1357_v6, %v1356_v5  ;;  %v2402_v15 = vpack.c.bf16 %v1375_v9, %v1374_v8  ;;  %v2432_v22 = vpack.c.bf16 %v1389_v11, %v1388_v10  ;;  %v2434_v30 = vpack.c.bf16 %v1407_v19, %v1406_v20  ;;  %v1408_v32 = vld [vmem:[%s3412_s4 + $0x1d0] sm:$0xff]  ;;  %v1409_v33 = vld [vmem:[%s3412_s4 + $0x1d8] sm:$0xff]  ;;  %v1378_v39 = vld [vmem:[%s3412_s4 + $0xe0] sm:$0xff] }
 0x5d4   :  { %2387 = vmatprep.subr.bf16.mxu1 %v2386_v16  ;;  %v1359_v16 = vld [vmem:[%s3412_s4 + $0x48] sm:$0xff]  ;;  %v2406_v43 = vpack.c.bf16 %v1377_v18, %v1376_v17  ;;  %v2436_v54 = vpack.c.bf16 %v1391_v27, %v1390_v25  ;;  %v2438_v60 = vpack.c.bf16 %v1409_v33, %v1408_v32  ;;  %v1394_v2 = vld [vmem:[%s3412_s4 + $0x160] sm:$0xff]  ;;  %v2414_v52 = vpack.c.bf16 %v1381_v41, %v1380_v40  ;;  %v1412_v58 = vld [vmem:[%s3412_s4 + $0x1f0] sm:$0xff] }
 0x5d5   :  { %2385 = vmatpush1.bf16.msk.msra.mxu0 %vm2384_vm1, %v2383_v35  ;;  %v2404_v28 = vpack.c.bf16 %v1359_v16, %v1358_v24  ;;  %v1410_v35 = vld [vmem:[%s3412_s4 + $0x1e0] sm:$0xff]  ;;  %v1395_v46 = vld [vmem:[%s3412_s4 + $0x168] sm:$0xff]  ;;  %v1396_v61 = vld [vmem:[%s3412_s4 + $0x170] sm:$0xff] }
 0x5d6   :  { %1603 = vmatmul.mubr.msk.f32.vlgmr.msra.gmra.mrb[16].mxu1 %vm596_vm7, %v1188_v36  ;;  %2419 = vmatprep.subr.bf16.mxu0 %v2418_v34  ;;  %v1392_v34 = vld [vmem:[%s3412_s4 + $0x150] sm:$0xff]  ;;  %v2444_v53 = vpack.c.bf16 %v1395_v46, %v1394_v2  ;;  %v1615_v6 = vld [vmem:[%s3408_s8 + $0x7] ss:$0 sm:$0xff] }
 0x5d7   :  { %1266 = vmatprep.mubr.f32.mxu1 %v2460_v3  ;;  %2389 = vmatpush3.bf16.msra.mxu1 %v2388_v63  ;;  %v2410_v63 = vpack.c.bf16 %v1379_v57, %v1378_v39 }
 0x5d8   :  { %1613 = vmatmul.mubr.msk.f32.vlgmr.msra.gmra.mrb[20].mxu0 %vm596_vm7, %v1188_v36  ;;  %2391 = vmatprep.subr.bf16.mxu1 %v2390_v44  ;;  %v1411_v36 = vld [vmem:[%s3412_s4 + $0x1e8] sm:$0xff]  ;;  %v2440_v44 = vpack.c.bf16 %v1393_v48, %v1392_v34 }
 0x5d9   :  { %1343 = vmatprep.mubr.f32.mxu0 %v2460_v3  ;;  %2421 = vmatpush3.bf16.msra.mxu0 %v2420_v45  ;;  %v1387_v3 = vld [vmem:[%s3412_s4 + $0x128] sm:$0xff]  ;;  %v2442_v45 = vpack.c.bf16 %v1411_v36, %v1410_v35 }
 0x5da   :  { %1604 = vmatmul.mubr.msk.f32.gmra.mrb[18].mxu1 %vm596_vm7, %v1189_v55  ;;  %2423 = vmatprep.subr.bf16.mxu0 %v2422_v50  ;;  %v2428_v7 = vpack.c.bf16 %v1387_v3, %v1386_v4  ;;  %v2412_v50 = vpack.c.bf16 %v1363_v38, %v1362_v37 }
 0x5db   :  { %2393 = vmatpush3.bf16.msra.mxu1 %v2392_v56  ;;  %v1365_v56 = vld [vmem:[%s3412_s4 + $0x78] sm:$0xff] }
 0x5dc   :  { %1614 = vmatmul.mubr.msk.f32.gmra.mrb[22].mxu0 %vm596_vm7, %v1189_v55  ;;  %2395 = vmatprep.subr.bf16.mxu1 %v2394_v59  ;;  %v1364_v55 = vld [vmem:[%s3412_s4 + $0x70] sm:$0xff]  ;;  %v1413_v59 = vld [vmem:[%s3412_s4 + $0x1f8] sm:$0xff] }
 0x5dd   :  { %2425 = vmatpush3.bf16.msra.mxu0 %v2424_v0  ;;  %v2416_v13 = vpack.c.bf16 %v1365_v56, %v1364_v55  ;;  %v2446_v62 = vpack.c.bf16 %v1413_v59, %v1412_v58  ;;  %v1397_v0 = vld [vmem:[%s3412_s4 + $0x178] sm:$0xff] }
 0x5de   :  { %2427 = vmatprep.subr.bf16.mxu0 %v2426_v49  ;;  %v2448_v1 = vpack.c.bf16 %v1397_v0, %v1396_v61 }
 0x5df   :  { %2397 = vmatpush3.bf16.msra.mxu1 %v2396_v14 }
 0x5e0   :  { %2399 = vmatprep.subr.bf16.mxu1 %v2398_v31 }
 0x5e1   :  { %2429 = vmatpush3.bf16.msra.mxu0 %v2428_v7 }
 0x5e2   :  { %2431 = vmatprep.subr.bf16.mxu0 %v2430_v26 }
 0x5e3   :  { %2401 = vmatpush3.bf16.msra.mxu1 %v2400_v12 }
 0x5e4   :  { %2403 = vmatprep.subr.bf16.mxu1 %v2402_v15 }
 0x5e5   :  { %2433 = vmatpush3.bf16.msra.mxu0 %v2432_v22 }
 0x5e6   :  { %2435 = vmatprep.subr.bf16.mxu0 %v2434_v30 }
 0x5e7   :  { %2405 = vmatpush3.bf16.msra.mxu1 %v2404_v28 }
 0x5e8   :  { %2407 = vmatprep.subr.bf16.mxu1 %v2406_v43 }
 0x5e9   :  { %2437 = vmatpush3.bf16.msra.mxu0 %v2436_v54 }
 0x5ea   :  { %2439 = vmatprep.subr.bf16.mxu0 %v2438_v60 }
 0x5eb   :  { %2409 = vmatpush3.bf16.msra.mxu1 %v2408_v29 }
 0x5ec   :  { %2411 = vmatprep.subr.bf16.mxu1 %v2410_v63 }
 0x5ed   :  { %2441 = vmatpush3.bf16.msra.mxu0 %v2440_v44 }
 0x5ee   :  { %2443 = vmatprep.subr.bf16.mxu0 %v2442_v45 }
 0x5ef   :  { %2413 = vmatpush3.bf16.msra.mxu1 %v2412_v50 }
 0x5f0   :  { %2415 = vmatprep.subr.bf16.mxu1 %v2414_v52 }
 0x5f1   :  { %2445 = vmatpush3.bf16.msra.mxu0 %v2444_v53 }
 0x5f2   :  { %2447 = vmatprep.subr.bf16.mxu0 %v2446_v62 }
 0x5f3   :  { %2417 = vmatpush3.bf16.msra.mxu1 %v2416_v13 }
 0x5f5   :  { %2449 = vmatpush3.bf16.msra.mxu0 %v2448_v1 }
 0x6a9   :  { %v1262_v42 = vpop.f32.mrb[16].mxu1 }
 0x6aa   :  { %v1264_v49 = vpop.f32.mrb[17].mxu1 }
 0x6ab   :  { %v1339_v4 = vpop.f32.mrb[20].mxu0  ;;  %1482 = vmatprep.mubr.f32.mxu1 %v1264_v49 }
 0x6ac   :  { %v1341_v3 = vpop.f32.mrb[21].mxu0  ;;  %1483 = vmatmul.mubr.f32.vlgmr.msra.gmra.mrb[20].mxu1 %v1262_v42 }
 0x6ad   :  { %1557 = vmatprep.mubr.f32.mxu0 %v1341_v3  ;;  %v1268_v14 = vpop.f32.mrb[18].mxu1 }
 0x6ae   :  { %1558 = vmatmul.mubr.f32.vlgmr.msra.gmra.mrb[24].mxu0 %v1339_v4  ;;  %v1270_v21 = vpop.f32.mrb[19].mxu1 }
 0x6af   :  { %v1345_v23 = vpop.f32.mrb[22].mxu0  ;;  %1487 = vmatprep.mubr.f32.mxu1 %v1270_v21 }
 0x6b0   :  { %v1347_v31 = vpop.f32.mrb[23].mxu0  ;;  %1488 = vmatmul.mubr.f32.gmra.mrb[22].mxu1 %v1268_v14 }
 0x6b1   :  { %1562 = vmatprep.mubr.f32.mxu0 %v1347_v31 }
 0x6b2   :  { %1563 = vmatmul.mubr.f32.gmra.mrb[26].mxu0 %v1345_v23 }
 0x77f   :  { %v1858_v5 = vpop.f32.mrb[20].mxu1 }
 0x780   :  { %v1859_v7 = vpop.f32.mrb[21].mxu1 }
 0x781   :  { %v1860_v8 = vadd.f32 %v1859_v7, %v1858_v5  ;;  %v1896_v9 = vpop.f32.mrb[24].mxu0 }
 0x782   :  { %v1897_v26 = vpop.f32.mrb[25].mxu0 }
 0x783   :  { %v1485_v10 = vadd.f32 %v1860_v8, %v1615_v6  ;;  %v1898_v11 = vadd.f32 %v1897_v26, %v1896_v9  ;;  %v1861_v12 = vpop.f32.mrb[22].mxu1 }
 0x784   :  { %v1862_v20 = vpop.f32.mrb[23].mxu1 }
 0x785   :  { %v1560_v19 = vadd.f32 %v1898_v11, %v1485_v10  ;;  %v1863_v15 = vadd.f32 %v1862_v20, %v1861_v12  ;;  %v1899_v24 = vpop.f32.mrb[26].mxu0 }
 0x786   :  { %v1900_v16 = vpop.f32.mrb[27].mxu0 }
 0x787   :  { %1568 = vst [vmem:[%s3414_s9] sm:$0xff] %v1560_v19  ;;  %v1490_v22 = vadd.f32 %v1863_v15, %v1615_v6  ;;  %v1901_v17 = vadd.f32 %v1900_v16, %v1899_v24 }
 0x789   :  { %v1565_v18 = vadd.f32 %v1901_v17, %v1490_v22 }
 0x78b   :  { %1569 = vst [vmem:[%s3414_s9 + $0x8] sm:$0xff] %v1565_v18 }

</bundles_post_ra>
